<compile_context>
chip_gen: v7x
topology: tpu7x:2x2x1
jax: 0.10.0
libtpu: 0.0.40
codegen_flags: <defaults>
</compile_context>

<pallas_src>
import math
import numpy as np
import jax
import jax.numpy as jnp
from jax.experimental import pallas as pl
from jax.experimental.pallas import tpu as pltpu

LEVEL_WEIGHTS = (1.0, 5.0, 10.0, 20.0)


# ---------------------------------------------------------------------------
# Gaussian kernel construction (matches prepare_GaussianKernel exactly)
# ---------------------------------------------------------------------------
def _gauss_1d(k):
    """Normalized 1-D Gaussian of size 2k+1 with sigma = size (float64 math)."""
    size = 2 * k + 1
    sigma = float(size)
    g = np.array(
        [math.exp(-((t - k) ** 2) / (2.0 * sigma * sigma)) for t in range(size)],
        dtype=np.float64,
    )
    return g / g.sum()


def _gaussian_kernel_2d(k):
    """2-D kernel exactly as the PyTorch module builds it (reference only)."""
    size = 2 * k + 1
    sigma = float(size)
    ker = np.zeros((size, size), dtype=np.float64)
    for i in range(size):
        for j in range(size):
            ker[i, j] = math.exp(
                -((i - k) ** 2 + (j - k) ** 2) / (2.0 * sigma * sigma)
            )
    ker /= ker.sum()
    return ker.astype(np.float32)


def _band_matrix(n, k):
    """Symmetric band matrix implementing a 'same' 1-D Gaussian conv with zero
    padding baked in (works as both row and column multiplier)."""
    g = _gauss_1d(k)
    m = np.zeros((n, n), dtype=np.float64)
    for d in range(-k, k + 1):
        m += np.diag(np.full(n - abs(d), g[k + d]), d)
    return m


# ---------------------------------------------------------------------------
# Pallas kernel
# ---------------------------------------------------------------------------
def _make_kernel(cb, H, W, compute_dtype):
    def kernel(gt_ref, pyr_ref, mask_ref, r_ref, ccat_ref, out_ref):
        # gt_ref:   (cb, H, W)     ground-truth normals (this channel block)
        # pyr_ref:  (4, cb, H, W)  predicted Laplacian pyramid slice
        # mask_ref: (H, W)         mask plane (shared across channels)
        # r_ref:    (3, H, H)      row band matrices, k = 1, 2, 3 (compute_dtype)
        # ccat_ref: (W, 3W)        [C1 | C2 | C3] column band matrices
        # out_ref:  (1, 1)         weighted SSE partial for this (b, cblock)
        m = mask_ref[...]                                   # (H, W) f32
        gt = gt_ref[...]                                    # (cb, H, W) f32

        # Column pass for all channels and all three kernel sizes in one MXU
        # matmul: (cb*H, W) @ (W, 3W) -> (cb*H, 3W), f32 accumulation.
        x2 = gt.reshape(cb * H, W).astype(compute_dtype)
        t = jnp.dot(x2, ccat_ref[...], preferred_element_type=jnp.float32)

        total = jnp.float32(0.0)
        for ch in range(cb):
            g0 = gt[ch]                                     # (H, W) f32
            tch = t[ch * H:(ch + 1) * H, :]                 # (H, 3W) f32

            def row_blur(kidx, _tch=tch):
                tk = _tch[:, kidx * W:(kidx + 1) * W].astype(compute_dtype)
                return jnp.dot(r_ref[kidx], tk,
                               preferred_element_type=jnp.float32)

            # Ordering bounds liveness: b7 -> lvl0, b5 -> lvl1, b3 -> lvl2/3.
            b7 = row_blur(2)                                # 7x7 blur
            d = (b7 - pyr_ref[0, ch]) * m                   # level 0
            total = total + LEVEL_WEIGHTS[0] * jnp.sum(d * d)

            b5 = row_blur(1)                                # 5x5 blur
            d = (b5 - b7 - pyr_ref[1, ch]) * m              # level 1
            total = total + LEVEL_WEIGHTS[1] * jnp.sum(d * d)

            b3 = row_blur(0)                                # 3x3 blur
            d = (b3 - b5 - pyr_ref[2, ch]) * m              # level 2
            total = total + LEVEL_WEIGHTS[2] * jnp.sum(d * d)

            d = (g0 - b3 - pyr_ref[3, ch]) * m              # level 3
            total = total + LEVEL_WEIGHTS[3] * jnp.sum(d * d)

        out_ref[...] = jnp.zeros((1, 1), jnp.float32) + total

    return kernel


# ---------------------------------------------------------------------------
# Wrapper
# ---------------------------------------------------------------------------
def pyramid_loss(gt_normal, normal_pyramid, mask, *,
                 compute_dtype=jnp.bfloat16,
                 vmem_budget_bytes=40 * 1024 * 1024):
    """gt_normal: (B,C,H,W); normal_pyramid: (4,B,C,H,W); mask: (B,1,H,W)."""
    B, C, H, W = gt_normal.shape
    assert normal_pyramid.shape == (4, B, C, H, W)

    gt = gt_normal.astype(jnp.float32)
    pyr = normal_pyramid.astype(jnp.float32)
    msk = mask.reshape(B, 1, H, W).astype(jnp.float32)

    itemsize = np.dtype(compute_dtype).itemsize
    rmats = jnp.asarray(
        np.stack([_band_matrix(H, k) for k in (1, 2, 3)]), dtype=compute_dtype)
    ccat = jnp.asarray(
        np.concatenate([_band_matrix(W, k) for k in (1, 2, 3)], axis=1),
        dtype=compute_dtype)

    plane = H * W * 4                                       # one f32 (H,W) plane

    def _estimate(cb_):
        band = (3 * H * H + 3 * W * W) * itemsize           # band matrices
        blocks = (5 * cb_ + 1) * plane                      # gt + 4*pyr + mask
        est = 2 * (blocks + band)                           # double-buffered
        est += 3 * cb_ * plane + cb_ * H * W * itemsize     # t + bf16 gt copy
        est += 4 * plane                                    # live blur/diff planes
        return est

    # Largest channel block (divisor of C) whose working set fits the budget.
    cb = 1
    for d in range(1, C + 1):
        if C % d == 0 and _estimate(d) <= vmem_budget_bytes:
            cb = d
    n_cblk = C // cb

    vmem_limit = int(min(max(_estimate(cb) * 1.25, 32 * 1024 * 1024),
                         64 * 1024 * 1024))

    partial = pl.pallas_call(
        _make_kernel(cb, H, W, compute_dtype),
        out_shape=jax.ShapeDtypeStruct((B, n_cblk, 1, 1), jnp.float32),
        grid_spec=pltpu.PrefetchScalarGridSpec(
            num_scalar_prefetch=0,
            grid=(B, n_cblk),
            in_specs=[
                pl.BlockSpec((None, cb, H, W), lambda b, c: (b, c, 0, 0)),
                pl.BlockSpec((4, None, cb, H, W), lambda b, c: (0, b, c, 0, 0)),
                pl.BlockSpec((None, None, H, W), lambda b, c: (b, 0, 0, 0)),
                pl.BlockSpec((3, H, H), lambda b, c: (0, 0, 0)),
                pl.BlockSpec((W, 3 * W), lambda b, c: (0, 0)),
            ],
            out_specs=pl.BlockSpec((None, None, 1, 1), lambda b, c: (b, c, 0, 0)),
        ),
        compiler_params=pltpu.CompilerParams(
            dimension_semantics=("parallel", "parallel"),
            vmem_limit_bytes=vmem_limit,
        ),
    )(gt, pyr, msk, rmats, ccat)

    # Each level's MSE is a mean over B*C*H*W elements; weights already folded.
    return jnp.sum(partial) / np.float32(B * C * H * W)


# ---------------------------------------------------------------------------
# Pure-JAX reference mirroring the PyTorch module (F.conv2d depthwise)
# ---------------------------------------------------------------------------
def _reference_loss(gt_normal, normal_pyramid, mask):
    B, C, H, W = gt_normal.shape

    def blur(img, k):
        ker = jnp.asarray(_gaussian_kernel_2d(k))
        filt = jnp.broadcast_to(ker[None, None], (C, 1, 2 * k + 1, 2 * k + 1))
        return jax.lax.conv_general_dilated(
            img, filt, window_strides=(1, 1), padding=[(k, k), (k, k)],
            dimension_numbers=("NCHW", "OIHW", "NCHW"),
            feature_group_count=C)

    img0 = gt_normal
    img1, img2, img3 = blur(img0, 1), blur(img0, 2), blur(img0, 3)
    gt_pyr = [img3, img2 - img3, img1 - img2, img0 - img1]
    m = jnp.broadcast_to(mask, (B, C, H, W))
    loss = jnp.float32(0.0)
    for lvl in range(4):
        d = gt_pyr[lvl] * m - normal_pyramid[lvl] * m
        loss = loss + LEVEL_WEIGHTS[lvl] * jnp.mean(d * d)
    return loss


if __name__ == "__main__":
    key = jax.random.PRNGKey(0)
    k1, k2, k3 = jax.random.split(key, 3)
    B, C, H, W = 2, 3, 16, 16  # demo size; real images just enlarge H/W blocks
    gt_normal = jax.random.normal(k1, (B, C, H, W), dtype=jnp.float32)
    normal_pyramid = jax.random.normal(k2, (4, B, C, H, W), dtype=jnp.float32)
    mask = (jax.random.uniform(k3, (B, 1, H, W)) > 0.3).astype(jnp.float32)

    loss = jax.block_until_ready(pyramid_loss(gt_normal, normal_pyramid, mask))
    ref = jax.block_until_ready(_reference_loss(gt_normal, normal_pyramid, mask))
    # bf16 MXU operands (f32 accumulation) -> allow ~0.5% relative deviation
    # from the pure-f32 conv reference.
    assert np.allclose(np.asarray(loss), np.asarray(ref), rtol=5e-3, atol=1e-4), (loss, ref)
    print("KERNEL_OK")
</pallas_src>

<mosaic_0001>
module attributes {stable_mosaic.version = 11 : i64} {
  func.func @kernel(%arg0: i32, %arg1: i32, %arg2: memref<1x3x16x16xf32, #tpu.memory_space<vmem>>, %arg3: memref<4x1x3x16x16xf32, #tpu.memory_space<vmem>>, %arg4: memref<1x1x16x16xf32, #tpu.memory_space<vmem>>, %arg5: memref<3x16x16xbf16, #tpu.memory_space<vmem>>, %arg6: memref<16x48xbf16, #tpu.memory_space<vmem>>, %arg7: memref<1x1x1x1xf32, #tpu.memory_space<vmem>>) attributes {dimension_semantics = [#tpu.dimension_semantics<parallel>, #tpu.dimension_semantics<parallel>], iteration_bounds = array<i64: 2, 1>, scalar_prefetch = 0 : i64, scratch_operands = 0 : i64, tpu.core_type = #tpu.core_type<tc>, window_params = [{transform_indices = @transform_0, window_bounds = array<i64: 1, 3, 16, 16>}, {transform_indices = @transform_1, window_bounds = array<i64: 4, 1, 3, 16, 16>}, {transform_indices = @transform_2, window_bounds = array<i64: 1, 1, 16, 16>}, {pipeline_mode = #tpu.pipeline_mode<synchronous>, transform_indices = @transform_3, window_bounds = array<i64: 3, 16, 16>}, {pipeline_mode = #tpu.pipeline_mode<synchronous>, transform_indices = @transform_4, window_bounds = array<i64: 16, 48>}, {transform_indices = @transform_5, window_bounds = array<i64: 1, 1, 1, 1>}]} {
    %c0 = arith.constant 0 : index
    %c0_0 = arith.constant 0 : index
    %c0_1 = arith.constant 0 : index
    %c0_2 = arith.constant 0 : index
    %0 = vector.load %arg4[%c0, %c0_0, %c0_1, %c0_2] : memref<1x1x16x16xf32, #tpu.memory_space<vmem>>, vector<1x1x16x16xf32>
    %1 = vector.shape_cast %0 : vector<1x1x16x16xf32> to vector<16x16xf32>
    %c0_3 = arith.constant 0 : index
    %c0_4 = arith.constant 0 : index
    %c0_5 = arith.constant 0 : index
    %c0_6 = arith.constant 0 : index
    %2 = vector.load %arg2[%c0_3, %c0_4, %c0_5, %c0_6] : memref<1x3x16x16xf32, #tpu.memory_space<vmem>>, vector<1x3x16x16xf32>
    %3 = vector.shape_cast %2 : vector<1x3x16x16xf32> to vector<3x16x16xf32>
    %4 = vector.shape_cast %3 : vector<3x16x16xf32> to vector<48x16xf32>
    %5 = arith.truncf %4 : vector<48x16xf32> to vector<48x16xbf16>
    %c0_7 = arith.constant 0 : index
    %c0_8 = arith.constant 0 : index
    %6 = vector.load %arg6[%c0_7, %c0_8] : memref<16x48xbf16, #tpu.memory_space<vmem>>, vector<16x48xbf16>
    %cst = arith.constant dense<0.000000e+00> : vector<48x48xf32>
    %7 = tpu.matmul %5, %6, %cst {dimension_numbers = #tpu.dot_dimension_numbers<[1], [0], [0], [1], [0, 0, 1, 1], [], []>} : vector<48x16xbf16>, vector<16x48xbf16>, vector<48x48xf32> -> vector<48x48xf32>
    %8 = vector.extract_strided_slice %3 {offsets = [0, 0, 0], sizes = [1, 16, 16], strides = [1, 1, 1]} : vector<3x16x16xf32> to vector<1x16x16xf32>
    %9 = vector.shape_cast %8 : vector<1x16x16xf32> to vector<16x16xf32>
    %10 = vector.extract_strided_slice %7 {offsets = [0, 0], sizes = [16, 48], strides = [1, 1]} : vector<48x48xf32> to vector<16x48xf32>
    %11 = vector.extract_strided_slice %10 {offsets = [0, 32], sizes = [16, 16], strides = [1, 1]} : vector<16x48xf32> to vector<16x16xf32>
    %12 = arith.truncf %11 : vector<16x16xf32> to vector<16x16xbf16>
    %c2 = arith.constant 2 : index
    %c0_9 = arith.constant 0 : index
    %c0_10 = arith.constant 0 : index
    %13 = vector.load %arg5[%c2, %c0_9, %c0_10] : memref<3x16x16xbf16, #tpu.memory_space<vmem>>, vector<1x16x16xbf16>
    %14 = vector.shape_cast %13 : vector<1x16x16xbf16> to vector<16x16xbf16>
    %cst_11 = arith.constant dense<0.000000e+00> : vector<16x16xf32>
    %15 = tpu.matmul %14, %12, %cst_11 {dimension_numbers = #tpu.dot_dimension_numbers<[1], [0], [0], [1], [0, 0, 1, 1], [], []>} : vector<16x16xbf16>, vector<16x16xbf16>, vector<16x16xf32> -> vector<16x16xf32>
    %c0_12 = arith.constant 0 : index
    %c0_13 = arith.constant 0 : index
    %c0_14 = arith.constant 0 : index
    %c0_15 = arith.constant 0 : index
    %c0_16 = arith.constant 0 : index
    %16 = vector.load %arg3[%c0_12, %c0_13, %c0_14, %c0_15, %c0_16] : memref<4x1x3x16x16xf32, #tpu.memory_space<vmem>>, vector<1x1x1x16x16xf32>
    %17 = vector.shape_cast %16 : vector<1x1x1x16x16xf32> to vector<16x16xf32>
    %18 = arith.subf %15, %17 : vector<16x16xf32>
    %19 = arith.mulf %18, %1 : vector<16x16xf32>
    %20 = arith.mulf %19, %19 : vector<16x16xf32>
    %21 = vector.shape_cast %20 : vector<16x16xf32> to vector<1x16x16xf32>
    %cst_17 = arith.constant dense<0.000000e+00> : vector<1xf32>
    %22 = vector.multi_reduction <add>, %21, %cst_17 [1, 2] : vector<1x16x16xf32> to vector<1xf32>
    %23 = vector.shape_cast %22 : vector<1xf32> to vector<1x1x1xf32>
    %24 = vector.extract %23[0, 0, 0] : f32 from vector<1x1x1xf32>
    %cst_18 = arith.constant 1.000000e+00 : f32
    %25 = arith.mulf %cst_18, %24 : f32
    %cst_19 = arith.constant 0.000000e+00 : f32
    %26 = arith.addf %cst_19, %25 : f32
    %27 = vector.extract_strided_slice %10 {offsets = [0, 16], sizes = [16, 16], strides = [1, 1]} : vector<16x48xf32> to vector<16x16xf32>
    %28 = arith.truncf %27 : vector<16x16xf32> to vector<16x16xbf16>
    %c1 = arith.constant 1 : index
    %c0_20 = arith.constant 0 : index
    %c0_21 = arith.constant 0 : index
    %29 = vector.load %arg5[%c1, %c0_20, %c0_21] : memref<3x16x16xbf16, #tpu.memory_space<vmem>>, vector<1x16x16xbf16>
    %30 = vector.shape_cast %29 : vector<1x16x16xbf16> to vector<16x16xbf16>
    %cst_22 = arith.constant dense<0.000000e+00> : vector<16x16xf32>
    %31 = tpu.matmul %30, %28, %cst_22 {dimension_numbers = #tpu.dot_dimension_numbers<[1], [0], [0], [1], [0, 0, 1, 1], [], []>} : vector<16x16xbf16>, vector<16x16xbf16>, vector<16x16xf32> -> vector<16x16xf32>
    %32 = arith.subf %31, %15 : vector<16x16xf32>
    %c1_23 = arith.constant 1 : index
    %c0_24 = arith.constant 0 : index
    %c0_25 = arith.constant 0 : index
    %c0_26 = arith.constant 0 : index
    %c0_27 = arith.constant 0 : index
    %33 = vector.load %arg3[%c1_23, %c0_24, %c0_25, %c0_26, %c0_27] : memref<4x1x3x16x16xf32, #tpu.memory_space<vmem>>, vector<1x1x1x16x16xf32>
    %34 = vector.shape_cast %33 : vector<1x1x1x16x16xf32> to vector<16x16xf32>
    %35 = arith.subf %32, %34 : vector<16x16xf32>
    %36 = arith.mulf %35, %1 : vector<16x16xf32>
    %37 = arith.mulf %36, %36 : vector<16x16xf32>
    %38 = vector.shape_cast %37 : vector<16x16xf32> to vector<1x16x16xf32>
    %cst_28 = arith.constant dense<0.000000e+00> : vector<1xf32>
    %39 = vector.multi_reduction <add>, %38, %cst_28 [1, 2] : vector<1x16x16xf32> to vector<1xf32>
    %40 = vector.shape_cast %39 : vector<1xf32> to vector<1x1x1xf32>
    %41 = vector.extract %40[0, 0, 0] : f32 from vector<1x1x1xf32>
    %cst_29 = arith.constant 5.000000e+00 : f32
    %42 = arith.mulf %cst_29, %41 : f32
    %43 = arith.addf %26, %42 : f32
    %44 = vector.extract_strided_slice %10 {offsets = [0, 0], sizes = [16, 16], strides = [1, 1]} : vector<16x48xf32> to vector<16x16xf32>
    %45 = arith.truncf %44 : vector<16x16xf32> to vector<16x16xbf16>
    %c0_30 = arith.constant 0 : index
    %c0_31 = arith.constant 0 : index
    %c0_32 = arith.constant 0 : index
    %46 = vector.load %arg5[%c0_30, %c0_31, %c0_32] : memref<3x16x16xbf16, #tpu.memory_space<vmem>>, vector<1x16x16xbf16>
    %47 = vector.shape_cast %46 : vector<1x16x16xbf16> to vector<16x16xbf16>
    %cst_33 = arith.constant dense<0.000000e+00> : vector<16x16xf32>
    %48 = tpu.matmul %47, %45, %cst_33 {dimension_numbers = #tpu.dot_dimension_numbers<[1], [0], [0], [1], [0, 0, 1, 1], [], []>} : vector<16x16xbf16>, vector<16x16xbf16>, vector<16x16xf32> -> vector<16x16xf32>
    %49 = arith.subf %48, %31 : vector<16x16xf32>
    %c2_34 = arith.constant 2 : index
    %c0_35 = arith.constant 0 : index
    %c0_36 = arith.constant 0 : index
    %c0_37 = arith.constant 0 : index
    %c0_38 = arith.constant 0 : index
    %50 = vector.load %arg3[%c2_34, %c0_35, %c0_36, %c0_37, %c0_38] : memref<4x1x3x16x16xf32, #tpu.memory_space<vmem>>, vector<1x1x1x16x16xf32>
    %51 = vector.shape_cast %50 : vector<1x1x1x16x16xf32> to vector<16x16xf32>
    %52 = arith.subf %49, %51 : vector<16x16xf32>
    %53 = arith.mulf %52, %1 : vector<16x16xf32>
    %54 = arith.mulf %53, %53 : vector<16x16xf32>
    %55 = vector.shape_cast %54 : vector<16x16xf32> to vector<1x16x16xf32>
    %cst_39 = arith.constant dense<0.000000e+00> : vector<1xf32>
    %56 = vector.multi_reduction <add>, %55, %cst_39 [1, 2] : vector<1x16x16xf32> to vector<1xf32>
    %57 = vector.shape_cast %56 : vector<1xf32> to vector<1x1x1xf32>
    %58 = vector.extract %57[0, 0, 0] : f32 from vector<1x1x1xf32>
    %cst_40 = arith.constant 1.000000e+01 : f32
    %59 = arith.mulf %cst_40, %58 : f32
    %60 = arith.addf %43, %59 : f32
    %61 = arith.subf %9, %48 : vector<16x16xf32>
    %c3 = arith.constant 3 : index
    %c0_41 = arith.constant 0 : index
    %c0_42 = arith.constant 0 : index
    %c0_43 = arith.constant 0 : index
    %c0_44 = arith.constant 0 : index
    %62 = vector.load %arg3[%c3, %c0_41, %c0_42, %c0_43, %c0_44] : memref<4x1x3x16x16xf32, #tpu.memory_space<vmem>>, vector<1x1x1x16x16xf32>
    %63 = vector.shape_cast %62 : vector<1x1x1x16x16xf32> to vector<16x16xf32>
    %64 = arith.subf %61, %63 : vector<16x16xf32>
    %65 = arith.mulf %64, %1 : vector<16x16xf32>
    %66 = arith.mulf %65, %65 : vector<16x16xf32>
    %67 = vector.shape_cast %66 : vector<16x16xf32> to vector<1x16x16xf32>
    %cst_45 = arith.constant dense<0.000000e+00> : vector<1xf32>
    %68 = vector.multi_reduction <add>, %67, %cst_45 [1, 2] : vector<1x16x16xf32> to vector<1xf32>
    %69 = vector.shape_cast %68 : vector<1xf32> to vector<1x1x1xf32>
    %70 = vector.extract %69[0, 0, 0] : f32 from vector<1x1x1xf32>
    %cst_46 = arith.constant 2.000000e+01 : f32
    %71 = arith.mulf %cst_46, %70 : f32
    %72 = arith.addf %60, %71 : f32
    %73 = vector.extract_strided_slice %3 {offsets = [1, 0, 0], sizes = [1, 16, 16], strides = [1, 1, 1]} : vector<3x16x16xf32> to vector<1x16x16xf32>
    %74 = vector.shape_cast %73 : vector<1x16x16xf32> to vector<16x16xf32>
    %75 = vector.extract_strided_slice %7 {offsets = [16, 0], sizes = [16, 48], strides = [1, 1]} : vector<48x48xf32> to vector<16x48xf32>
    %76 = vector.extract_strided_slice %75 {offsets = [0, 32], sizes = [16, 16], strides = [1, 1]} : vector<16x48xf32> to vector<16x16xf32>
    %77 = arith.truncf %76 : vector<16x16xf32> to vector<16x16xbf16>
    %c2_47 = arith.constant 2 : index
    %c0_48 = arith.constant 0 : index
    %c0_49 = arith.constant 0 : index
    %78 = vector.load %arg5[%c2_47, %c0_48, %c0_49] : memref<3x16x16xbf16, #tpu.memory_space<vmem>>, vector<1x16x16xbf16>
    %79 = vector.shape_cast %78 : vector<1x16x16xbf16> to vector<16x16xbf16>
    %cst_50 = arith.constant dense<0.000000e+00> : vector<16x16xf32>
    %80 = tpu.matmul %79, %77, %cst_50 {dimension_numbers = #tpu.dot_dimension_numbers<[1], [0], [0], [1], [0, 0, 1, 1], [], []>} : vector<16x16xbf16>, vector<16x16xbf16>, vector<16x16xf32> -> vector<16x16xf32>
    %c0_51 = arith.constant 0 : index
    %c0_52 = arith.constant 0 : index
    %c1_53 = arith.constant 1 : index
    %c0_54 = arith.constant 0 : index
    %c0_55 = arith.constant 0 : index
    %81 = vector.load %arg3[%c0_51, %c0_52, %c1_53, %c0_54, %c0_55] : memref<4x1x3x16x16xf32, #tpu.memory_space<vmem>>, vector<1x1x1x16x16xf32>
    %82 = vector.shape_cast %81 : vector<1x1x1x16x16xf32> to vector<16x16xf32>
    %83 = arith.subf %80, %82 : vector<16x16xf32>
    %84 = arith.mulf %83, %1 : vector<16x16xf32>
    %85 = arith.mulf %84, %84 : vector<16x16xf32>
    %86 = vector.shape_cast %85 : vector<16x16xf32> to vector<1x16x16xf32>
    %cst_56 = arith.constant dense<0.000000e+00> : vector<1xf32>
    %87 = vector.multi_reduction <add>, %86, %cst_56 [1, 2] : vector<1x16x16xf32> to vector<1xf32>
    %88 = vector.shape_cast %87 : vector<1xf32> to vector<1x1x1xf32>
    %89 = vector.extract %88[0, 0, 0] : f32 from vector<1x1x1xf32>
    %cst_57 = arith.constant 1.000000e+00 : f32
    %90 = arith.mulf %cst_57, %89 : f32
    %91 = arith.addf %72, %90 : f32
    %92 = vector.extract_strided_slice %75 {offsets = [0, 16], sizes = [16, 16], strides = [1, 1]} : vector<16x48xf32> to vector<16x16xf32>
    %93 = arith.truncf %92 : vector<16x16xf32> to vector<16x16xbf16>
    %c1_58 = arith.constant 1 : index
    %c0_59 = arith.constant 0 : index
    %c0_60 = arith.constant 0 : index
    %94 = vector.load %arg5[%c1_58, %c0_59, %c0_60] : memref<3x16x16xbf16, #tpu.memory_space<vmem>>, vector<1x16x16xbf16>
    %95 = vector.shape_cast %94 : vector<1x16x16xbf16> to vector<16x16xbf16>
    %cst_61 = arith.constant dense<0.000000e+00> : vector<16x16xf32>
    %96 = tpu.matmul %95, %93, %cst_61 {dimension_numbers = #tpu.dot_dimension_numbers<[1], [0], [0], [1], [0, 0, 1, 1], [], []>} : vector<16x16xbf16>, vector<16x16xbf16>, vector<16x16xf32> -> vector<16x16xf32>
    %97 = arith.subf %96, %80 : vector<16x16xf32>
    %c1_62 = arith.constant 1 : index
    %c0_63 = arith.constant 0 : index
    %c1_64 = arith.constant 1 : index
    %c0_65 = arith.constant 0 : index
    %c0_66 = arith.constant 0 : index
    %98 = vector.load %arg3[%c1_62, %c0_63, %c1_64, %c0_65, %c0_66] : memref<4x1x3x16x16xf32, #tpu.memory_space<vmem>>, vector<1x1x1x16x16xf32>
    %99 = vector.shape_cast %98 : vector<1x1x1x16x16xf32> to vector<16x16xf32>
    %100 = arith.subf %97, %99 : vector<16x16xf32>
    %101 = arith.mulf %100, %1 : vector<16x16xf32>
    %102 = arith.mulf %101, %101 : vector<16x16xf32>
    %103 = vector.shape_cast %102 : vector<16x16xf32> to vector<1x16x16xf32>
    %cst_67 = arith.constant dense<0.000000e+00> : vector<1xf32>
    %104 = vector.multi_reduction <add>, %103, %cst_67 [1, 2] : vector<1x16x16xf32> to vector<1xf32>
    %105 = vector.shape_cast %104 : vector<1xf32> to vector<1x1x1xf32>
    %106 = vector.extract %105[0, 0, 0] : f32 from vector<1x1x1xf32>
    %cst_68 = arith.constant 5.000000e+00 : f32
    %107 = arith.mulf %cst_68, %106 : f32
    %108 = arith.addf %91, %107 : f32
    %109 = vector.extract_strided_slice %75 {offsets = [0, 0], sizes = [16, 16], strides = [1, 1]} : vector<16x48xf32> to vector<16x16xf32>
    %110 = arith.truncf %109 : vector<16x16xf32> to vector<16x16xbf16>
    %c0_69 = arith.constant 0 : index
    %c0_70 = arith.constant 0 : index
    %c0_71 = arith.constant 0 : index
    %111 = vector.load %arg5[%c0_69, %c0_70, %c0_71] : memref<3x16x16xbf16, #tpu.memory_space<vmem>>, vector<1x16x16xbf16>
    %112 = vector.shape_cast %111 : vector<1x16x16xbf16> to vector<16x16xbf16>
    %cst_72 = arith.constant dense<0.000000e+00> : vector<16x16xf32>
    %113 = tpu.matmul %112, %110, %cst_72 {dimension_numbers = #tpu.dot_dimension_numbers<[1], [0], [0], [1], [0, 0, 1, 1], [], []>} : vector<16x16xbf16>, vector<16x16xbf16>, vector<16x16xf32> -> vector<16x16xf32>
    %114 = arith.subf %113, %96 : vector<16x16xf32>
    %c2_73 = arith.constant 2 : index
    %c0_74 = arith.constant 0 : index
    %c1_75 = arith.constant 1 : index
    %c0_76 = arith.constant 0 : index
    %c0_77 = arith.constant 0 : index
    %115 = vector.load %arg3[%c2_73, %c0_74, %c1_75, %c0_76, %c0_77] : memref<4x1x3x16x16xf32, #tpu.memory_space<vmem>>, vector<1x1x1x16x16xf32>
    %116 = vector.shape_cast %115 : vector<1x1x1x16x16xf32> to vector<16x16xf32>
    %117 = arith.subf %114, %116 : vector<16x16xf32>
    %118 = arith.mulf %117, %1 : vector<16x16xf32>
    %119 = arith.mulf %118, %118 : vector<16x16xf32>
    %120 = vector.shape_cast %119 : vector<16x16xf32> to vector<1x16x16xf32>
    %cst_78 = arith.constant dense<0.000000e+00> : vector<1xf32>
    %121 = vector.multi_reduction <add>, %120, %cst_78 [1, 2] : vector<1x16x16xf32> to vector<1xf32>
    %122 = vector.shape_cast %121 : vector<1xf32> to vector<1x1x1xf32>
    %123 = vector.extract %122[0, 0, 0] : f32 from vector<1x1x1xf32>
    %cst_79 = arith.constant 1.000000e+01 : f32
    %124 = arith.mulf %cst_79, %123 : f32
    %125 = arith.addf %108, %124 : f32
    %126 = arith.subf %74, %113 : vector<16x16xf32>
    %c3_80 = arith.constant 3 : index
    %c0_81 = arith.constant 0 : index
    %c1_82 = arith.constant 1 : index
    %c0_83 = arith.constant 0 : index
    %c0_84 = arith.constant 0 : index
    %127 = vector.load %arg3[%c3_80, %c0_81, %c1_82, %c0_83, %c0_84] : memref<4x1x3x16x16xf32, #tpu.memory_space<vmem>>, vector<1x1x1x16x16xf32>
    %128 = vector.shape_cast %127 : vector<1x1x1x16x16xf32> to vector<16x16xf32>
    %129 = arith.subf %126, %128 : vector<16x16xf32>
    %130 = arith.mulf %129, %1 : vector<16x16xf32>
    %131 = arith.mulf %130, %130 : vector<16x16xf32>
    %132 = vector.shape_cast %131 : vector<16x16xf32> to vector<1x16x16xf32>
    %cst_85 = arith.constant dense<0.000000e+00> : vector<1xf32>
    %133 = vector.multi_reduction <add>, %132, %cst_85 [1, 2] : vector<1x16x16xf32> to vector<1xf32>
    %134 = vector.shape_cast %133 : vector<1xf32> to vector<1x1x1xf32>
    %135 = vector.extract %134[0, 0, 0] : f32 from vector<1x1x1xf32>
    %cst_86 = arith.constant 2.000000e+01 : f32
    %136 = arith.mulf %cst_86, %135 : f32
    %137 = arith.addf %125, %136 : f32
    %138 = vector.extract_strided_slice %3 {offsets = [2, 0, 0], sizes = [1, 16, 16], strides = [1, 1, 1]} : vector<3x16x16xf32> to vector<1x16x16xf32>
    %139 = vector.shape_cast %138 : vector<1x16x16xf32> to vector<16x16xf32>
    %140 = vector.extract_strided_slice %7 {offsets = [32, 0], sizes = [16, 48], strides = [1, 1]} : vector<48x48xf32> to vector<16x48xf32>
    %141 = vector.extract_strided_slice %140 {offsets = [0, 32], sizes = [16, 16], strides = [1, 1]} : vector<16x48xf32> to vector<16x16xf32>
    %142 = arith.truncf %141 : vector<16x16xf32> to vector<16x16xbf16>
    %c2_87 = arith.constant 2 : index
    %c0_88 = arith.constant 0 : index
    %c0_89 = arith.constant 0 : index
    %143 = vector.load %arg5[%c2_87, %c0_88, %c0_89] : memref<3x16x16xbf16, #tpu.memory_space<vmem>>, vector<1x16x16xbf16>
    %144 = vector.shape_cast %143 : vector<1x16x16xbf16> to vector<16x16xbf16>
    %cst_90 = arith.constant dense<0.000000e+00> : vector<16x16xf32>
    %145 = tpu.matmul %144, %142, %cst_90 {dimension_numbers = #tpu.dot_dimension_numbers<[1], [0], [0], [1], [0, 0, 1, 1], [], []>} : vector<16x16xbf16>, vector<16x16xbf16>, vector<16x16xf32> -> vector<16x16xf32>
    %c0_91 = arith.constant 0 : index
    %c0_92 = arith.constant 0 : index
    %c2_93 = arith.constant 2 : index
    %c0_94 = arith.constant 0 : index
    %c0_95 = arith.constant 0 : index
    %146 = vector.load %arg3[%c0_91, %c0_92, %c2_93, %c0_94, %c0_95] : memref<4x1x3x16x16xf32, #tpu.memory_space<vmem>>, vector<1x1x1x16x16xf32>
    %147 = vector.shape_cast %146 : vector<1x1x1x16x16xf32> to vector<16x16xf32>
    %148 = arith.subf %145, %147 : vector<16x16xf32>
    %149 = arith.mulf %148, %1 : vector<16x16xf32>
    %150 = arith.mulf %149, %149 : vector<16x16xf32>
    %151 = vector.shape_cast %150 : vector<16x16xf32> to vector<1x16x16xf32>
    %cst_96 = arith.constant dense<0.000000e+00> : vector<1xf32>
    %152 = vector.multi_reduction <add>, %151, %cst_96 [1, 2] : vector<1x16x16xf32> to vector<1xf32>
    %153 = vector.shape_cast %152 : vector<1xf32> to vector<1x1x1xf32>
    %154 = vector.extract %153[0, 0, 0] : f32 from vector<1x1x1xf32>
    %cst_97 = arith.constant 1.000000e+00 : f32
    %155 = arith.mulf %cst_97, %154 : f32
    %156 = arith.addf %137, %155 : f32
    %157 = vector.extract_strided_slice %140 {offsets = [0, 16], sizes = [16, 16], strides = [1, 1]} : vector<16x48xf32> to vector<16x16xf32>
    %158 = arith.truncf %157 : vector<16x16xf32> to vector<16x16xbf16>
    %c1_98 = arith.constant 1 : index
    %c0_99 = arith.constant 0 : index
    %c0_100 = arith.constant 0 : index
    %159 = vector.load %arg5[%c1_98, %c0_99, %c0_100] : memref<3x16x16xbf16, #tpu.memory_space<vmem>>, vector<1x16x16xbf16>
    %160 = vector.shape_cast %159 : vector<1x16x16xbf16> to vector<16x16xbf16>
    %cst_101 = arith.constant dense<0.000000e+00> : vector<16x16xf32>
    %161 = tpu.matmul %160, %158, %cst_101 {dimension_numbers = #tpu.dot_dimension_numbers<[1], [0], [0], [1], [0, 0, 1, 1], [], []>} : vector<16x16xbf16>, vector<16x16xbf16>, vector<16x16xf32> -> vector<16x16xf32>
    %162 = arith.subf %161, %145 : vector<16x16xf32>
    %c1_102 = arith.constant 1 : index
    %c0_103 = arith.constant 0 : index
    %c2_104 = arith.constant 2 : index
    %c0_105 = arith.constant 0 : index
    %c0_106 = arith.constant 0 : index
    %163 = vector.load %arg3[%c1_102, %c0_103, %c2_104, %c0_105, %c0_106] : memref<4x1x3x16x16xf32, #tpu.memory_space<vmem>>, vector<1x1x1x16x16xf32>
    %164 = vector.shape_cast %163 : vector<1x1x1x16x16xf32> to vector<16x16xf32>
    %165 = arith.subf %162, %164 : vector<16x16xf32>
    %166 = arith.mulf %165, %1 : vector<16x16xf32>
    %167 = arith.mulf %166, %166 : vector<16x16xf32>
    %168 = vector.shape_cast %167 : vector<16x16xf32> to vector<1x16x16xf32>
    %cst_107 = arith.constant dense<0.000000e+00> : vector<1xf32>
    %169 = vector.multi_reduction <add>, %168, %cst_107 [1, 2] : vector<1x16x16xf32> to vector<1xf32>
    %170 = vector.shape_cast %169 : vector<1xf32> to vector<1x1x1xf32>
    %171 = vector.extract %170[0, 0, 0] : f32 from vector<1x1x1xf32>
    %cst_108 = arith.constant 5.000000e+00 : f32
    %172 = arith.mulf %cst_108, %171 : f32
    %173 = arith.addf %156, %172 : f32
    %174 = vector.extract_strided_slice %140 {offsets = [0, 0], sizes = [16, 16], strides = [1, 1]} : vector<16x48xf32> to vector<16x16xf32>
    %175 = arith.truncf %174 : vector<16x16xf32> to vector<16x16xbf16>
    %c0_109 = arith.constant 0 : index
    %c0_110 = arith.constant 0 : index
    %c0_111 = arith.constant 0 : index
    %176 = vector.load %arg5[%c0_109, %c0_110, %c0_111] : memref<3x16x16xbf16, #tpu.memory_space<vmem>>, vector<1x16x16xbf16>
    %177 = vector.shape_cast %176 : vector<1x16x16xbf16> to vector<16x16xbf16>
    %cst_112 = arith.constant dense<0.000000e+00> : vector<16x16xf32>
    %178 = tpu.matmul %177, %175, %cst_112 {dimension_numbers = #tpu.dot_dimension_numbers<[1], [0], [0], [1], [0, 0, 1, 1], [], []>} : vector<16x16xbf16>, vector<16x16xbf16>, vector<16x16xf32> -> vector<16x16xf32>
    %179 = arith.subf %178, %161 : vector<16x16xf32>
    %c2_113 = arith.constant 2 : index
    %c0_114 = arith.constant 0 : index
    %c2_115 = arith.constant 2 : index
    %c0_116 = arith.constant 0 : index
    %c0_117 = arith.constant 0 : index
    %180 = vector.load %arg3[%c2_113, %c0_114, %c2_115, %c0_116, %c0_117] : memref<4x1x3x16x16xf32, #tpu.memory_space<vmem>>, vector<1x1x1x16x16xf32>
    %181 = vector.shape_cast %180 : vector<1x1x1x16x16xf32> to vector<16x16xf32>
    %182 = arith.subf %179, %181 : vector<16x16xf32>
    %183 = arith.mulf %182, %1 : vector<16x16xf32>
    %184 = arith.mulf %183, %183 : vector<16x16xf32>
    %185 = vector.shape_cast %184 : vector<16x16xf32> to vector<1x16x16xf32>
    %cst_118 = arith.constant dense<0.000000e+00> : vector<1xf32>
    %186 = vector.multi_reduction <add>, %185, %cst_118 [1, 2] : vector<1x16x16xf32> to vector<1xf32>
    %187 = vector.shape_cast %186 : vector<1xf32> to vector<1x1x1xf32>
    %188 = vector.extract %187[0, 0, 0] : f32 from vector<1x1x1xf32>
    %cst_119 = arith.constant 1.000000e+01 : f32
    %189 = arith.mulf %cst_119, %188 : f32
    %190 = arith.addf %173, %189 : f32
    %191 = arith.subf %139, %178 : vector<16x16xf32>
    %c3_120 = arith.constant 3 : index
    %c0_121 = arith.constant 0 : index
    %c2_122 = arith.constant 2 : index
    %c0_123 = arith.constant 0 : index
    %c0_124 = arith.constant 0 : index
    %192 = vector.load %arg3[%c3_120, %c0_121, %c2_122, %c0_123, %c0_124] : memref<4x1x3x16x16xf32, #tpu.memory_space<vmem>>, vector<1x1x1x16x16xf32>
    %193 = vector.shape_cast %192 : vector<1x1x1x16x16xf32> to vector<16x16xf32>
    %194 = arith.subf %191, %193 : vector<16x16xf32>
    %195 = arith.mulf %194, %1 : vector<16x16xf32>
    %196 = arith.mulf %195, %195 : vector<16x16xf32>
    %197 = vector.shape_cast %196 : vector<16x16xf32> to vector<1x16x16xf32>
    %cst_125 = arith.constant dense<0.000000e+00> : vector<1xf32>
    %198 = vector.multi_reduction <add>, %197, %cst_125 [1, 2] : vector<1x16x16xf32> to vector<1xf32>
    %199 = vector.shape_cast %198 : vector<1xf32> to vector<1x1x1xf32>
    %200 = vector.extract %199[0, 0, 0] : f32 from vector<1x1x1xf32>
    %cst_126 = arith.constant 2.000000e+01 : f32
    %201 = arith.mulf %cst_126, %200 : f32
    %202 = arith.addf %190, %201 : f32
    %cst_127 = arith.constant 0.000000e+00 : f32
    %203 = vector.broadcast %cst_127 : f32 to vector<1x1xf32>
    %204 = vector.broadcast %202 : f32 to vector<1x1xf32>
    %205 = arith.addf %203, %204 : vector<1x1xf32>
    %c0_128 = arith.constant 0 : index
    %c0_129 = arith.constant 0 : index
    %c0_130 = arith.constant 0 : index
    %c0_131 = arith.constant 0 : index
    %206 = vector.load %arg7[%c0_128, %c0_129, %c0_130, %c0_131] : memref<1x1x1x1xf32, #tpu.memory_space<vmem>>, vector<1x1x1x1xf32>
    %207 = vector.shape_cast %206 : vector<1x1x1x1xf32> to vector<1x1xf32>
    %208 = vector.shape_cast %205 : vector<1x1xf32> to vector<1x1x1x1xf32>
    tpu.vector_store %arg7[%c0_128, %c0_129, %c0_130, %c0_131], %208 {strides = array<i32>} : memref<1x1x1x1xf32, #tpu.memory_space<vmem>>, vector<1x1x1x1xf32>,
    return
  }
  func.func @transform_0(%arg0: i32, %arg1: i32) -> (i32, i32, i32, i32) {
    %c0_i32 = arith.constant 0 : i32
    %c0_i32_0 = arith.constant 0 : i32
    %c0_i32_1 = arith.constant 0 : i32
    return %arg0, %arg1, %c0_i32, %c0_i32_0 : i32, i32, i32, i32
  }
  func.func @transform_1(%arg0: i32, %arg1: i32) -> (i32, i32, i32, i32, i32) {
    %c0_i32 = arith.constant 0 : i32
    %c0_i32_0 = arith.constant 0 : i32
    %c0_i32_1 = arith.constant 0 : i32
    %c0_i32_2 = arith.constant 0 : i32
    return %c0_i32, %arg0, %arg1, %c0_i32_0, %c0_i32_1 : i32, i32, i32, i32, i32
  }
  func.func @transform_2(%arg0: i32, %arg1: i32) -> (i32, i32, i32, i32) {
    %c0_i32 = arith.constant 0 : i32
    %c0_i32_0 = arith.constant 0 : i32
    %c0_i32_1 = arith.constant 0 : i32
    %c0_i32_2 = arith.constant 0 : i32
    return %arg0, %c0_i32, %c0_i32_0, %c0_i32_1 : i32, i32, i32, i32
  }
  func.func @transform_3(%arg0: i32, %arg1: i32) -> (i32, i32, i32) {
    %c0_i32 = arith.constant 0 : i32
    %c0_i32_0 = arith.constant 0 : i32
    %c0_i32_1 = arith.constant 0 : i32
    %c0_i32_2 = arith.constant 0 : i32
    return %c0_i32, %c0_i32_0, %c0_i32_1 : i32, i32, i32
  }
  func.func @transform_4(%arg0: i32, %arg1: i32) -> (i32, i32) {
    %c0_i32 = arith.constant 0 : i32
    %c0_i32_0 = arith.constant 0 : i32
    %c0_i32_1 = arith.constant 0 : i32
    return %c0_i32, %c0_i32_0 : i32, i32
  }
  func.func @transform_5(%arg0: i32, %arg1: i32) -> (i32, i32, i32, i32) {
    %c0_i32 = arith.constant 0 : i32
    %c0_i32_0 = arith.constant 0 : i32
    %c0_i32_1 = arith.constant 0 : i32
    return %arg0, %arg1, %c0_i32, %c0_i32_0 : i32, i32, i32, i32
  }
}

</mosaic_0001>

<bundles_post_ra>
// kernel: tpu_custom_call.1
= control target key start
LH: loop header
LB: loop body
LE: loop exit
PB: predicated region body
PF: predicated region fallthrough
CT: control target
= control target key end

     0   :  { %s2198_s0 = inlined_call_operand.hbm [shape: f32[2,3,16,16], index: 0, kind: input, shape index: {}]   ;;  %s2199_s1 = inlined_call_operand.hbm [shape: f32[4,2,3,16,16], index: 1, kind: input, shape index: {}]   ;;  %s2200_s2 = inlined_call_operand.hbm [shape: f32[2,1,16,16], index: 2, kind: input, shape index: {}]   ;;  %s2201_s3 = inlined_call_operand.hbm [shape: bf16[3,16,16], index: 3, kind: input, shape index: {}]   ;;  %s2202_s4 = inlined_call_operand.vmem [shape: bf16[16,48], index: 4, kind: input, shape index: {}]   ;;  %s2203_s5 = inlined_call_operand.vmem [shape: f32[2,1,1,1], index: 5, kind: output, shape index: {}]  }
   0x1   :  { %2212 = sst [smem:[#allocation15_spill]] %s2198_s0 }
   0x2   :  { %2213 = sst [smem:[#allocation16_spill]] %s2199_s1 }
   0x3   :  { %2214 = sst [smem:[#allocation17_spill]] %s2200_s2 }
   0x4   :  { %10 = vsyncpa [#allocation3], 0 }
   0x5   :  { %12 = vsyncpa [#allocation3 + $0x1], 0 }
   0x6   :  { %13 = vsyncpa [#allocation5], 0 }
   0x7   :  { %15 = vsyncpa [#allocation5 + $0x1], 0 }
   0x8   :  { %16 = vsyncpa [#allocation8], 0  ;;  %s1789_s18 = smov 0   ;;  %s1791_s19 = smov 0  }
   0x9   :  { %s1793_s20 = smov 0   ;;  %s1795_s21 = smov 0  }
   0xa   :  { %s1797_s22 = smov 0   ;;  %s1799_s23 = smov 0  }
   0xb LB: > { %s2209_s24 = sadd.s32 4294967295, %s1740_s23   ;;  %s34_s25 = sadd.s32 1, %s1736_s22  ;;  %s1740_s23 = sphi %s1799_s23, %s22_s23   ;;  %s1736_s22 = sphi %s1797_s22, %s2234_s22   ;;  %s1732_s21 = sphi %s1795_s21, %s2233_s21   ;;  %s1728_s20 = sphi %s1793_s20, %s2232_s20   ;;  %s1724_s19 = sphi %s1791_s19, %s2231_s19   ;;  %s1720_s18 = sphi %s1789_s18, %s2230_s18  }
   0xc   : > { %p36_p0 = scmp.ge.s32.totalorder %s34_s25, 2  ;;  %s43_s26 = sadd.s32 1, %s1728_s20 }
   0xd   : > { %p50_p1 = scmp.ne.s32.totalorder %s1728_s20, %s1724_s19  ;;  %p51_p2 = scmp.eq.s32.totalorder %s1740_s23, 0 }
   0xe   : > { %s2236_s25 = smov (%p36_p0, %s34_s25), 0  ;;  %p56_p4 = scmp.ne.s32.totalorder %s1724_s19, %s1720_s18 }
   0xf   : > { %p1825_p3 = por %p51_p2, %p50_p1  ;;  %s38_s28 = ssub.s32 %s1736_s22, %s2236_s25 }
  0x10   : > { %p1834_p5 = scmp.eq.s32.totalorder %s2209_s24, 0  ;;  %p41_p6 = scmp.eq.s32.totalorder %s38_s28, 0 }
  0x11   : > { %s2215_s27 = scalar_select %p1825_p3, 1, 0 }
  0x12   : > { %s2216_s29 = scalar_select %p1834_p5, 1, 0 }
  0x13   : > { %p1334_p7 = scmp.ge.s32.totalorder %s1740_s23, 1  ;;  %p1841_p8 = por %p1834_p5, %p56_p4 }
  0x14   : > { %p191_p9 = scmp.lt.s32.totalorder %s1740_s23, 3  ;;  %s1742_s8 = smov [#allocation7]  }
  0x15   : > { %s2217_s30 = scalar_select %p1841_p8, 1, 0 }
  0x16   : > { %s1847_s6 = scalar_select %p41_p6, %s1728_s20, %s43_s26  }
  0x17   : > { %p1849_p10 = pnand %p1334_p7, %p191_p9  ;;  %s203_s9 = sshll.u32 %s1742_s8, 4  ;;  %s204_s9 = int_to_ptr.vmem [resolvable:$true] %s203_s9 }
  0x18   : > { %s1598_s13 = scalar_lea.hbm %s2201_s3, 384 }
  0x19   : > { %s2218_s7 = scalar_select %p1849_p10, 1, 0 }
  0x1a   : > { %p1525_p11 = pneg %p1849_p10  ;;  %p1599_p13 = scmp.ne.s32.totalorder %s2201_s3, %s1598_s13 }
  0x1b   : > { %p1605_p4 = scmp.lt.u32.totalorder %s1598_s13, %s2201_s3 }
  0x1c   : > { %p1857_p12 = pnand %p1525_p11, %p1834_p5 }
  0x1e   : > { %p1600_p0 = pneg %p1857_p12 }
  0x20   : > { %p1601_p1 = pnand %p1600_p0, %p1599_p13 }
  0x22   : > { %p1602_p2 = pneg %p1601_p1 }
  0x24   : > { %p1607_p6 = pnand %p1605_p4, %p1602_p2 }
  0x26   : > { %1610 = shalt.err (!%p1607_p6)
}
  0x27   : > { %s1611_s18 = scalar_lea.vmem %s204_s9, 384  ;;  %p1619_p5 = scmp.lt.s32.totalorder %s204_s9, %s204_s9 }
  0x28   : > { %p1612_p7 = scmp.ne.s32.totalorder %s204_s9, %s1611_s18  ;;  %p1620_p8 = scmp.lt.s32.totalorder %s1611_s18, %s1611_s18 }
  0x2a   : > { %p1614_p9 = pnand %p1612_p7, %p1600_p0  ;;  %p1621_p10 = por %p1620_p8, %p1619_p5 }
  0x2c   : > { %p1615_p11 = pneg %p1614_p9 }
  0x2e   : > { %p1622_p3 = pnand %p1621_p10, %p1615_p11 }
  0x30   : > { %1625 = shalt.err (!%p1622_p3)
}
  0x31   : > { %s1743_s26 = smov 64   ;;  %s1744_s28 = smov 4  }
  0x32   : > { %1528 = dma.hbm_to_vmem [thread:$0]  (!%p1857_p12), %s2201_s3, 384, %s204_s9, [#allocation8], %s1743_s26, %s1743_s26, %s1744_s28  }
  0x33   : > { %p1336_p13 = scmp.ge.s32.totalorder %s1740_s23, 2 }
  0x34   : > { %s1879_s12 = sand.u32 (!%p1336_p13), 1, %s1728_s20   ;;  %s1479_s13 = smul.u32 (!%p1336_p13), 768, %s1736_s22 }
  0x35   : > { %216 = sbr.rel (%p1336_p13) target bundleno = 125 (0x7d), region = 24  ;;  %s2220_s0 = sld [smem:[#allocation15_spill]] (!%p1336_p13) }
  0x36   : > { %s1478_s14 = smul.u32 (!%p1336_p13), 48, %s1879_s12  ;;  %s221_s18 = scalar_lea.sflag (!%p1336_p13), [#allocation3], %s1879_s12 }
  0x37   : > { %p2221_p5 = scmp.ne.s32.totalorder (!%p1336_p13), %s2215_s27, 0 }
  0x38   : > { %s224_s9 = scalar_lea.vmem (!%p1336_p13), [#allocation2], %s1478_s14 }
  0x39   : > { %s234_s17 = sshll.u32 (!%p1336_p13), %s224_s9, 4  ;;  %s1890_s17 = int_to_ptr.vmem [resolvable:$true] %s234_s17 }
  0x3b   : > { %s1888_s16 = scalar_lea.hbm (!%p1336_p13), %s2220_s0, %s1479_s13  ;;  %s1630_s11 = scalar_lea.hbm (!%p1336_p13), %s2220_s0, 1536 }
  0x3c   : > { %s1626_s26 = scalar_lea.hbm %s1888_s16, 768  ;;  %p1631_p12 = scmp.lt.u32.totalorder %s1888_s16, %s2220_s0 }
  0x3d   : > { %p1627_p3 = scmp.ne.s32.totalorder %s1888_s16, %s1626_s26  ;;  %p1632_p0 = scmp.lt.u32.totalorder %s1630_s11, %s1626_s26 }
  0x3e   : > { %p1634_p2 = scmp.lt.u32.totalorder %s1626_s26, %s1888_s16 }
  0x3f   : > { %p1628_p8 = pnand %p1627_p3, %p2221_p5  ;;  %p1633_p1 = por %p1632_p0, %p1631_p12 }
  0x41   : > { %p1629_p10 = pneg %p1628_p8  ;;  %p1635_p4 = por %p1634_p2, %p1633_p1 }
  0x43   : > { %p1636_p6 = pnand %p1635_p4, %p1629_p10 }
  0x45   : > { %1639 = shalt.err (!%p1636_p6)
}
  0x46   : > { %s1640_s14 = scalar_lea.vmem %s1890_s17, 768  ;;  %s1745_s9 = smov [#allocation2]  }
  0x47   : > { %p1641_p7 = scmp.ne.s32.totalorder %s1890_s17, %s1640_s14  ;;  %s1644_s28 = sshll.u32 %s1745_s9, 4  ;;  %s1645_s28 = int_to_ptr.vmem [resolvable:$false] %s1644_s28 }
  0x48   : > { %s1646_s8 = scalar_lea.vmem %s1645_s28, 1536  ;;  %p1647_p13 = scmp.lt.s32.totalorder %s1890_s17, %s1645_s28 }
  0x49   : > { %p1642_p9 = pnand %p1641_p7, %p2221_p5  ;;  %p1648_p3 = scmp.lt.s32.totalorder %s1646_s8, %s1640_s14 }
  0x4b   : > { %p1643_p11 = pneg %p1642_p9  ;;  %p1649_p8 = por %p1648_p3, %p1647_p13 }
  0x4d   : > { %p1650_p12 = pnand %p1649_p8, %p1643_p11 }
  0x4f   : > { %1653 = shalt.err (!%p1650_p12)
}
  0x50   : > { %s2210_s26 = smov 128   ;;  %s2211_s11 = smov 8  }
  0x51   : > { %1510 = dma.hbm_to_vmem [thread:$0]  (%p2221_p5), %s1888_s16, 768, %s1890_s17, %s221_s18, %s2210_s26, %s2210_s26, %s2211_s11  }
  0x52   : > { %s244_s15 = sand.u32 1, %s1740_s23   ;;  %s1480_s10 = smul.u32 192, %s1879_s12 }
  0x53   : > { %s1511_s14 = scalar_select %p2221_p5, [#allocation0], [#allocation11] }
  0x54   : > { %s2222_s1 = sld [smem:[#allocation16_spill]]  ;;  %s1748_s16 = smov 1536  }
  0x55   : > { %1512 = sst [smem:[#allocation10]] (%p2221_p5), %s1748_s16  ;;  %s248_s18 = scalar_lea.vmem [#allocation4], %s1480_s10 }
  0x56   : > { %s262_s17 = sld [smem:[%s1511_s14]]   ;;  %s270_s24 = sshll.u32 %s248_s18, 4  ;;  %s271_s24 = int_to_ptr.vmem [resolvable:$true] %s270_s24 }
  0x57   : > { %s1749_s26 = smov 768   ;;  %s1750_s11 = smov 6  }
  0x58   : > { %1513 = sst [smem:[#allocation10 + $0x1]] (%p2221_p5), %s1749_s26  ;;  %s1751_s0 = smov 128  }
  0x59   : > { %1514 = sst [smem:[#allocation10 + $0x2]] (%p2221_p5), %s1750_s11  ;;  %s1752_s9 = smov 8  }
  0x5a   : > { %s257_s8 = scalar_lea.hbm %s2222_s1, %s1479_s13  ;;  %1515 = sst [smem:[#allocation10 + $0x3]] (%p2221_p5), %s1751_s0 }
  0x5b   : > { %1516 = sst [smem:[#allocation10 + $0x4]] (%p2221_p5), %s1751_s0  ;;  %s1940_s10 = scalar_lea.sflag [#allocation5], %s244_s15 }
  0x5c   : > { %s1339_s13 = sshll.u32 %s262_s17, 26  ;;  %1517 = sst [smem:[#allocation10 + $0x5]] (%p2221_p5), %s1752_s9 }
  0x5d   : > { %s1340_s14 = sadd.s32 134217728, %s1339_s13  ;;  %s1753_s28 = smov [#allocation9]  }
  0x5e   : > { %1518 = dma.general (%p2221_p5), %s257_s8, 3072, %s271_s24, %s1940_s10, %s1753_s28, [#allocation10], %s1340_s14, 0  }
  0x5f   : > { %s1341_s26 = sshll.u32 %s1879_s12, 4  ;;  %s1387_s11 = sshll.u32 %s1736_s22, 8 }
  0x60   : > { %s2223_s2 = sld [smem:[#allocation17_spill]]  ;;  %s297_s15 = scalar_lea.vmem [#allocation6], %s1341_s26 }
  0x61   : > { %s304_s17 = sshll.u32 %s297_s15, 4  ;;  %s1952_s17 = int_to_ptr.vmem [resolvable:$true] %s304_s17 }
  0x66   : > { %s1950_s0 = scalar_lea.hbm %s2223_s2, %s1387_s11  ;;  %s1658_s8 = scalar_lea.hbm %s2223_s2, 512 }
  0x67   : > { %s1654_s13 = scalar_lea.hbm %s1950_s0, 256  ;;  %p1659_p2 = scmp.lt.u32.totalorder %s1950_s0, %s2223_s2 }
  0x68   : > { %p1655_p10 = scmp.ne.s32.totalorder %s1950_s0, %s1654_s13  ;;  %p1660_p4 = scmp.lt.u32.totalorder %s1658_s8, %s1654_s13 }
  0x69   : > { %p1662_p7 = scmp.lt.u32.totalorder %s1654_s13, %s1950_s0 }
  0x6a   : > { %p1656_p0 = pnand %p1655_p10, %p2221_p5  ;;  %p1661_p6 = por %p1660_p4, %p1659_p2 }
  0x6c   : > { %p1657_p1 = pneg %p1656_p0  ;;  %p1663_p9 = por %p1662_p7, %p1661_p6 }
  0x6e   : > { %p1664_p11 = pnand %p1663_p9, %p1657_p1 }
  0x70   : > { %1667 = shalt.err (!%p1664_p11)
}
  0x71   : > { %s1668_s28 = scalar_lea.vmem %s1952_s17, 256  ;;  %s1754_s26 = smov [#allocation6]  }
  0x72   : > { %p1669_p13 = scmp.ne.s32.totalorder %s1952_s17, %s1668_s28  ;;  %s1672_s11 = sshll.u32 %s1754_s26, 4  ;;  %s1673_s11 = int_to_ptr.vmem [resolvable:$false] %s1672_s11 }
  0x73   : > { %s1674_s16 = scalar_lea.vmem %s1673_s11, 512  ;;  %p1675_p12 = scmp.lt.s32.totalorder %s1952_s17, %s1673_s11 }
  0x74   : > { %p1670_p3 = pnand %p1669_p13, %p2221_p5  ;;  %p1676_p10 = scmp.lt.s32.totalorder %s1674_s16, %s1668_s28 }
  0x76   : > { %p1671_p8 = pneg %p1670_p3  ;;  %p1677_p0 = por %p1676_p10, %p1675_p12 }
  0x78   : > { %p1678_p2 = pnand %p1677_p0, %p1671_p8 }
  0x7a   : > { %1681 = shalt.err (!%p1678_p2)
}
  0x7b   : > { %s2224_s18 = smov 8   ;;  %s2225_s15 = smov 128  }
  0x7c   : > { %1519 = dma.hbm_to_vmem [thread:$0]  (%p2221_p5), %s1950_s0, 256, %s1952_s17, %s1940_s10, %s2225_s15, %s2225_s15, %s2224_s18  }
  0x7d PF: > { %p2226_p1 = scmp.ne.s32.totalorder %s2218_s7, 0 }
  0x7e   : > { %s318_s13 = sand.u32 (!%p2226_p1), 1, %s1724_s19   ;;  %p2227_p4 = scmp.ne.s32.totalorder (!%p2226_p1), %s2217_s30, 0 }
  0x7f   : > { %316 = sbr.rel (%p2226_p1) target bundleno = 959 (0x3bf), region = 40  ;;  %s319_s12 = scalar_lea.sflag (!%p2226_p1), [#allocation3], %s318_s13 }
  0x80   : > { %s1482_s24 = smul.u32 (!%p2226_p1), 48, %s318_s13 }
  0x82   : > { %s1982_s8 = scalar_lea.vmem (!%p2226_p1), [#allocation2], %s1482_s24 }
  0x86   : > { %1707 = dma.done.wait (%p2227_p4), %s319_s12, 768  }
  0x87   : > { %1709 = vsyncadd (%p2227_p4), %s319_s12, 4294966528  ;;  %s2228_s27 = sadd.s32 4294967295, %s1740_s23   ;;  %s1483_s0 = smul.u32 192, %s318_s13 }
  0x88   : > { %s327_s10 = sand.u32 1, %s2228_s27  }
  0x89   : > { %s328_s17 = scalar_lea.sflag [#allocation5], %s327_s10  ;;  %s1990_s7 = scalar_lea.vmem [#allocation4], %s1483_s0 }
  0x8a   : > { %1711 = dma.done.wait (%p2227_p4), %s328_s17, 3328  }
  0x8b   : > { %1713 = vsyncadd (%p2227_p4), %s328_s17, 4294963968  ;;  %s1345_s9 = sshll.u32 %s318_s13, 4  ;;  %p2229_p5 = scmp.ne.s32.totalorder %s2216_s29, 0 }
  0x8c   : > { %s1996_s14 = scalar_lea.vmem [#allocation6], %s1345_s9 }
  0x8d   : > { %1715 = dma.done.wait (%p2229_p5), [#allocation8], 384  }
  0x8e   : > { %1717 = vsyncadd (%p2229_p5), [#allocation8], 4294966912  ;;  %v1755_v0 = vmov 0.0   ;;  %vm1756_vm0 = vmmov 0   ;;  %v1594_v1 = vld [vmem:[%s2202_s4] sm:$0xff]   ;;  %v2015_v3 = vld [vmem:[%s1982_s8 + $0x8] sm:$0xff] }
  0x8f   : > { %1410 = vmatprep.subr.bf16.mxu0 %v1755_v0  ;;  %1412 = vmatprep.mubr.msk.bf16.mxu0 %vm1756_vm0, %v1755_v0  ;;  %v2012_v2 = vld [vmem:[%s1982_s8] sm:$0xff]  ;;  %vm410_vm1 = vcmask 130048   ;;  %v2024_v5 = vld [vmem:[%s1982_s8 + $0x10] sm:$0xff]  ;;  %v2027_v6 = vld [vmem:[%s1982_s8 + $0x18] sm:$0xff]  ;;  %s1757_s28 = smov 96   ;;  %s1758_s26 = smov 112  }
  0x90   : > { %1424 = vmatprep.subr.bf16.mxu1 %v1755_v0  ;;  %1426 = vmatprep.mubr.msk.bf16.mxu1 %vm1756_vm0, %v1755_v0  ;;  %v399_v4 = vpack.c.bf16 %v2015_v3, %v2012_v2  ;;  %v400_v7 = vpack.c.bf16 %v2027_v6, %v2024_v5  ;;  %v2035_v8 = vld [vmem:[%s1982_s8 + $0x20] sm:$0xff]  ;;  %v2038_v9 = vld [vmem:[%s1982_s8 + $0x28] sm:$0xff]  ;;  %p384_p6 = scmp.lt.s32.totalorder %s1732_s21, 1  ;;  %vm1194_vm2 = vcmask 0  }
  0x91   : > { %1411 = vmatpush3.bf16.msra.mxu0 %v1594_v1  ;;  %v401_v10 = vpack.c.bf16 %v2038_v9, %v2035_v8  ;;  %v1595_v27 = vld [vmem:[#allocation7 + $0x10] sm:$0xff]   ;;  %v1596_v30 = vld [vmem:[#allocation7 + $0x8] sm:$0xff]   ;;  %v1597_v32 = vld [vmem:[#allocation7] sm:$0xff]  }
  0x92   : > { %1442 = vmatprep.subr.bf16.mxu0 %v1755_v0  ;;  %v534_v35 = vld [vmem:[%s1990_s7] sm:$0xff]  ;;  %v535_v38 = vld [vmem:[%s1990_s7 + $0x8] sm:$0xff]  ;;  %v1364_v48 = vld [vmem:[%s1990_s7 + $0x10] sm:$0xff]  ;;  %s2238_s21 = smov (!%p384_p6, %s1732_s21), 1 }
  0x93   : > { %v2077_v36 = vld [vmem:[%s1996_s14] sm:$0xff]  ;;  %v2081_v41 = vld [vmem:[%s1996_s14 + $0x8] sm:$0xff] }
  0x94   : > { %1413 = vmatmul.mubr.msk.bf16.vlgmr.msra.gmra.mrb[0].mxu0 %vm410_vm1, %v399_v4  ;;  %v1355_v51 = vld [vmem:[%s1990_s7 + $0x30] sm:$0xff]  ;;  %v1365_v53 = vld [vmem:[%s1990_s7 + $0x18] sm:$0xff] }
  0x95   : > { %1416 = vmatprep.mubr.msk.bf16.mxu0 %vm1756_vm0, %v1755_v0  ;;  %v1356_v61 = vld [vmem:[%s1990_s7 + $0x38] sm:$0xff] }
  0x9c   : > { %1417 = vmatmul.mubr.msk.bf16.gmra.mrb[4].mxu0 %vm410_vm1, %v400_v7 }
  0x9d   : > { %1420 = vmatprep.mubr.msk.bf16.mxu0 %vm1756_vm0, %v1755_v0 }
  0xa4   : > { %1421 = vmatmul.mubr.msk.bf16.gmra.mrb[8].mxu0 %vm410_vm1, %v401_v10 }
  0xa5   : > { %1444 = vmatprep.mubr.msk.bf16.mxu0 %vm1756_vm0, %v1755_v0 }
 0x167   : > { %v454_v11 = vpop.f32.mrb[0].mxu0 }
 0x168   : > { %v1414_v12 = vpop.f32.mrb[1].mxu0 }
 0x169   : > { %v457_v13 = vpop.f32.mrb[2].mxu0 }
 0x16a   : > { %v477_v14 = vpack.c.bf16 %v457_v13, %v454_v11  ;;  %v1415_v15 = vpop.f32.mrb[3].mxu0 }
 0x16c   : > { %487 = vrot.lane.b32.xlu0 %v477_v14, %s1757_s28 }
 0x16f   : > { %v462_v16 = vpop.f32.mrb[4].mxu0 }
 0x170   : > { %563 = vrot.lane.b32.xlu0 %v477_v14, %s1758_s26  ;;  %v1418_v17 = vpop.f32.mrb[5].mxu0 }
 0x171   : > { %v465_v18 = vpop.f32.mrb[6].mxu0 }
 0x172   : > { %v736_v19 = vpack.c.bf16 %v465_v18, %v462_v16  ;;  %v1419_v20 = vpop.f32.mrb[7].mxu0 }
 0x173   : > { %v1359_v20 = vld [vmem:[%s1990_s7 + $0x60] sm:$0xff] }
 0x174   : > { %738 = vrot.lane.b32.xlu1 %v736_v19, %s1757_s28 }
 0x177   : > { %v470_v21 = vpop.f32.mrb[8].mxu0 }
 0x178   : > { %804 = vrot.lane.b32.xlu1 %v736_v19, %s1758_s26  ;;  %v1422_v22 = vpop.f32.mrb[9].mxu0 }
 0x179   : > { %v473_v23 = vpop.f32.mrb[10].mxu0 }
 0x17a   : > { %v964_v24 = vpack.c.bf16 %v473_v23, %v470_v21  ;;  %v1423_v25 = vpop.f32.mrb[11].mxu0  ;;  %v1361_v21 = vld [vmem:[%s1990_s7 + $0x90] sm:$0xff] }
 0x17c   : > { %966 = vrot.lane.b32.xlu0 %v964_v24, %s1757_s28  ;;  %1032 = vrot.lane.b32.xlu1 %v964_v24, %s1758_s26 }
 0x1de   : > { %v488_v26 = vpop.permute.xlu0 %487 }
 0x1df   : > { %1425 = vmatpush3.bf16.msra.mxu1 %v488_v26 }
 0x1e0   : > { %1430 = vmatprep.subr.bf16.mxu1 %v1755_v0 }
 0x1e2   : > { %1427 = vmatmul.mubr.msk.bf16.vlgmr.msra.gmra.mrb[0].mxu1 %vm410_vm1, %v1595_v27  ;;  %v564_v28 = vpop.permute.xlu0 %563 }
 0x1e3   : > { %1431 = vmatpush3.bf16.msra.mxu1 %v564_v28  ;;  %1432 = vmatprep.mubr.msk.bf16.mxu1 %vm1756_vm0, %v1755_v0 }
 0x1e4   : > { %1436 = vmatprep.subr.bf16.mxu1 %v1755_v0 }
 0x1e6   : > { %v739_v29 = vpop.permute.xlu1 %738 }
 0x1e7   : > { %1443 = vmatpush3.bf16.msra.mxu0 %v739_v29 }
 0x1e8   : > { %1454 = vmatprep.subr.bf16.mxu0 %v1755_v0 }
 0x1ea   : > { %1433 = vmatmul.mubr.msk.bf16.vlgmr.msra.gmra.mrb[4].mxu1 %vm410_vm1, %v1596_v30  ;;  %1445 = vmatmul.mubr.msk.bf16.vlgmr.msra.gmra.mrb[12].mxu0 %vm410_vm1, %v1595_v27  ;;  %v805_v31 = vpop.permute.xlu1 %804 }
 0x1eb   : > { %1437 = vmatpush3.bf16.msra.mxu1 %v477_v14  ;;  %1455 = vmatpush3.bf16.msra.mxu0 %v736_v19 }
 0x1ec   : > { %1438 = vmatprep.mubr.msk.bf16.mxu1 %vm1756_vm0, %v1755_v0  ;;  %1448 = vmatprep.subr.bf16.mxu1 %v1755_v0 }
 0x1ed   : > { %1456 = vmatprep.mubr.msk.bf16.mxu0 %vm1756_vm0, %v1755_v0  ;;  %1466 = vmatprep.subr.bf16.mxu0 %v1755_v0 }
 0x1ee   : > { %v1033_v33 = vpop.permute.xlu1 %1032  ;;  %v967_v34 = vpop.permute.xlu0 %966 }
 0x1f2   : > { %1439 = vmatmul.mubr.msk.bf16.vlgmr.msra.gmra.mrb[8].mxu1 %vm410_vm1, %v1597_v32  ;;  %1457 = vmatmul.mubr.msk.bf16.vlgmr.msra.gmra.mrb[16].mxu0 %vm410_vm1, %v1597_v32 }
 0x1f3   : > { %1449 = vmatpush3.bf16.msra.mxu1 %v805_v31  ;;  %1450 = vmatprep.mubr.msk.bf16.mxu1 %vm1756_vm0, %v1755_v0  ;;  %v1360_v31 = vld [vmem:[%s1990_s7 + $0x68] sm:$0xff] }
 0x1f4   : > { %1460 = vmatprep.subr.bf16.mxu1 %v1755_v0  ;;  %1467 = vmatpush3.bf16.msra.mxu0 %v1033_v33 }
 0x1f5   : > { %1468 = vmatprep.mubr.msk.bf16.mxu0 %vm1756_vm0, %v1755_v0 }
 0x1fa   : > { %1451 = vmatmul.mubr.msk.bf16.vlgmr.msra.gmra.mrb[12].mxu1 %vm410_vm1, %v1596_v30  ;;  %1469 = vmatmul.mubr.msk.bf16.vlgmr.msra.gmra.mrb[20].mxu0 %vm410_vm1, %v1596_v30 }
 0x1fb   : > { %1461 = vmatpush3.bf16.msra.mxu1 %v967_v34  ;;  %1462 = vmatprep.mubr.msk.bf16.mxu1 %vm1756_vm0, %v1755_v0 }
 0x1fc   : > { %1472 = vmatprep.subr.bf16.mxu1 %v1755_v0 }
 0x202   : > { %1463 = vmatmul.mubr.msk.bf16.vlgmr.msra.gmra.mrb[16].mxu1 %vm410_vm1, %v1595_v27  ;;  %v1372_v27 = vld [vmem:[%s1990_s7 + $0xa0] sm:$0xff] }
 0x203   : > { %1473 = vmatpush3.bf16.msra.mxu1 %v964_v24  ;;  %1474 = vmatprep.mubr.msk.bf16.mxu1 %vm1756_vm0, %v1755_v0 }
 0x20a   : > { %1475 = vmatmul.mubr.msk.bf16.vlgmr.msra.gmra.mrb[20].mxu1 %vm410_vm1, %v1597_v32  ;;  %v1362_v32 = vld [vmem:[%s1990_s7 + $0x98] sm:$0xff] }
 0x2b5   : > { %v527_v37 = vpop.f32.mrb[0].mxu1 }
 0x2b6   : > { %v536_v39 = vsub.f32 %v527_v37, %v534_v35  ;;  %v1428_v40 = vpop.f32.mrb[1].mxu1 }
 0x2b7   : > { %v530_v42 = vpop.f32.mrb[2].mxu1 }
 0x2b8   : > { %v538_v43 = vmul.f32 %v536_v39, %v2077_v36  ;;  %v537_v44 = vsub.f32 %v530_v42, %v535_v38  ;;  %v1429_v45 = vpop.f32.mrb[3].mxu1 }
 0x2ba   : > { %v540_v46 = vmul.f32 %v538_v43, %v538_v43  ;;  %v539_v47 = vmul.f32 %v537_v44, %v2081_v41  ;;  %v1373_v43 = vld [vmem:[%s1990_s7 + $0xa8] sm:$0xff] }
 0x2bc   : > { %v541_v49 = vmul.f32 %v539_v47, %v539_v47  ;;  %v542_v56 = vsel %vm410_vm1, %v540_v46, 0.0 }
 0x2bd   : > { %v603_v50 = vpop.f32.mrb[4].mxu1  ;;  %v2087_v52 = vpop.f32.mrb[12].mxu0 }
 0x2be   : > { %v610_v54 = vsub.f32 %v603_v50, %v527_v37  ;;  %v1434_v55 = vpop.f32.mrb[5].mxu1  ;;  %v543_v57 = vsel %vm410_vm1, %v541_v49, 0.0  ;;  %v785_v58 = vsub.f32 %v2087_v52, %v1364_v48  ;;  %v1446_v59 = vpop.f32.mrb[13].mxu0 }
 0x2bf   : > { %v606_v60 = vpop.f32.mrb[6].mxu1  ;;  %v544_v62 = vadd.f32 %v543_v57, %v542_v56  ;;  %v2094_v63 = vpop.f32.mrb[14].mxu0  ;;  %v1370_v59 = vld [vmem:[%s1990_s7 + $0x70] sm:$0xff] }
 0x2c0   : > { %v615_v0 = vsub.f32 %v610_v54, %v1355_v51  ;;  %v611_v1 = vsub.f32 %v606_v60, %v530_v42  ;;  %v1435_v4 = vpop.f32.mrb[7].mxu1  ;;  %v787_v7 = vmul.f32 %v785_v58, %v2077_v36  ;;  %v786_v10 = vsub.f32 %v2094_v63, %v1365_v53  ;;  %v1447_v11 = vpop.f32.mrb[15].mxu0  ;;  %v1367_v58 = vld [vmem:[%s1990_s7 + $0x40] sm:$0xff] }
 0x2c1   : > { %545 = vadd.xlane.f32.xlu0 %v544_v62 }
 0x2c2   : > { %v616_v12 = vsub.f32 %v611_v1, %v1356_v61  ;;  %v789_v13 = vmul.f32 %v787_v7, %v787_v7  ;;  %v788_v14 = vmul.f32 %v786_v10, %v2081_v41  ;;  %v617_v15 = vmul.f32 %v615_v0, %v2077_v36 }
 0x2c4   : > { %v790_v16 = vmul.f32 %v788_v14, %v788_v14  ;;  %v618_v17 = vmul.f32 %v616_v12, %v2081_v41  ;;  %v619_v18 = vmul.f32 %v617_v15, %v617_v15  ;;  %v791_v29 = vsel %vm410_vm1, %v789_v13, 0.0  ;;  %v1368_v13 = vld [vmem:[%s1990_s7 + $0x48] sm:$0xff]  ;;  %v1371_v14 = vld [vmem:[%s1990_s7 + $0x78] sm:$0xff] }
 0x2c5   : > { %v679_v19 = vpop.f32.mrb[8].mxu1  ;;  %v907_v22 = vpop.f32.mrb[16].mxu0 }
 0x2c6   : > { %v686_v23 = vsub.f32 %v679_v19, %v603_v50  ;;  %v711_v24 = vsub.f32 %v2012_v2, %v679_v19  ;;  %v1440_v25 = vpop.f32.mrb[9].mxu1  ;;  %v620_v26 = vmul.f32 %v618_v17, %v618_v17  ;;  %v1458_v28 = vpop.f32.mrb[17].mxu0  ;;  %v621_v33 = vsel %vm410_vm1, %v619_v18, 0.0 }
 0x2c7   : > { %v682_v30 = vpop.f32.mrb[10].mxu1  ;;  %v939_v34 = vsub.f32 %v2024_v5, %v907_v22  ;;  %v910_v35 = vpop.f32.mrb[18].mxu0  ;;  %v792_v37 = vsel %vm410_vm1, %v790_v16, 0.0 }
 0x2c8   : > { %v691_v38 = vsub.f32 %v686_v23, %v1359_v20  ;;  %v716_v39 = vsub.f32 %v711_v24, %v1361_v21  ;;  %v687_v2 = vsub.f32 %v682_v30, %v606_v60  ;;  %v712_v40 = vsub.f32 %v2015_v3, %v682_v30  ;;  %v1441_v42 = vpop.f32.mrb[11].mxu1  ;;  %v1459_v44 = vpop.f32.mrb[19].mxu0 }
 0x2c9   : > { %v622_v45 = vsel %vm410_vm1, %v620_v26, 0.0  ;;  %v944_v46 = vsub.f32 %v939_v34, %v1372_v27  ;;  %v940_v47 = vsub.f32 %v2027_v6, %v910_v35  ;;  %v793_v48 = vadd.f32 %v792_v37, %v791_v29 }
 0x2ca   : > { %v692_v5 = vsub.f32 %v687_v2, %v1360_v31  ;;  %v717_v49 = vsub.f32 %v712_v40, %v1362_v32  ;;  %v623_v50 = vadd.f32 %v622_v45, %v621_v33  ;;  %v693_v51 = vmul.f32 %v691_v38, %v2077_v36  ;;  %v1375_v33 = vld [vmem:[%s1990_s7 + $0x20] sm:$0xff]  ;;  %v1378_v2 = vld [vmem:[%s1990_s7 + $0x50] sm:$0xff]  ;;  %v1376_v40 = vld [vmem:[%s1990_s7 + $0x28] sm:$0xff] }
 0x2cb   : > { %v945_v53 = vsub.f32 %v940_v47, %v1373_v43  ;;  %v718_v54 = vmul.f32 %v716_v39, %v2077_v36  ;;  %v946_v3 = vmul.f32 %v944_v46, %v2077_v36 }
 0x2cc   : > { %624 = vadd.xlane.f32.xlu1 %v623_v50  ;;  %v694_v55 = vmul.f32 %v692_v5, %v2081_v41  ;;  %v695_v56 = vmul.f32 %v693_v51, %v693_v51  ;;  %v719_v57 = vmul.f32 %v717_v49, %v2081_v41  ;;  %v1379_v49 = vld [vmem:[%s1990_s7 + $0x58] sm:$0xff] }
 0x2cd   : > { %v841_v6 = vpop.f32.mrb[12].mxu1  ;;  %v2122_v60 = vpop.f32.mrb[20].mxu0  ;;  %v720_v61 = vmul.f32 %v718_v54, %v718_v54  ;;  %v947_v62 = vmul.f32 %v945_v53, %v2081_v41  ;;  %v948_v0 = vmul.f32 %v946_v3, %v946_v3 }
 0x2ce   : > { %v848_v1 = vsub.f32 %v841_v6, %v2087_v52  ;;  %v914_v4 = vsub.f32 %v907_v22, %v841_v6  ;;  %v1452_v7 = vpop.f32.mrb[13].mxu1  ;;  %v696_v10 = vmul.f32 %v694_v55, %v694_v55  ;;  %v1470_v11 = vpop.f32.mrb[21].mxu0  ;;  %v697_v15 = vsel %vm410_vm1, %v695_v56, 0.0 }
 0x2cf   : > { %v844_v12 = vpop.f32.mrb[14].mxu1  ;;  %v2129_v16 = vpop.f32.mrb[22].mxu0  ;;  %v721_v17 = vmul.f32 %v719_v57, %v719_v57  ;;  %v949_v18 = vmul.f32 %v947_v62, %v947_v62  ;;  %v950_v19 = vsel %vm410_vm1, %v948_v0, 0.0  ;;  %v722_v26 = vsel %vm410_vm1, %v720_v61, 0.0  ;;  %v1381_v11 = vld [vmem:[%s1990_s7 + $0x80] sm:$0xff] }
 0x2d0   : > { %v853_v20 = vsub.f32 %v848_v1, %v1367_v58  ;;  %v919_v21 = vsub.f32 %v914_v4, %v1370_v59  ;;  %v849_v52 = vsub.f32 %v844_v12, %v2094_v63  ;;  %v915_v22 = vsub.f32 %v910_v35, %v844_v12  ;;  %v1453_v23 = vpop.f32.mrb[15].mxu1  ;;  %794 = vadd.xlane.f32.xlu1 %v793_v48  ;;  %v1471_v24 = vpop.f32.mrb[23].mxu0  ;;  %v1383_v12 = vld [vmem:[%s1990_s7 + $0xb0] sm:$0xff] }
 0x2d1   : > { %v698_v25 = vsel %vm410_vm1, %v696_v10, 0.0  ;;  %v723_v27 = vsel %vm410_vm1, %v721_v17, 0.0  ;;  %v951_v28 = vsel %vm410_vm1, %v949_v18, 0.0 }
 0x2d2   : > { %v854_v29 = vsub.f32 %v849_v52, %v1368_v13  ;;  %v920_v30 = vsub.f32 %v915_v22, %v1371_v14  ;;  %v699_v31 = vadd.f32 %v698_v25, %v697_v15  ;;  %v724_v32 = vadd.f32 %v723_v27, %v722_v26  ;;  %v1382_v52 = vld [vmem:[%s1990_s7 + $0x88] sm:$0xff]  ;;  %v1384_v22 = vld [vmem:[%s1990_s7 + $0xb8] sm:$0xff] }
 0x2d3   : > { %v921_v63 = vmul.f32 %v919_v21, %v2077_v36  ;;  %v855_v34 = vmul.f32 %v853_v20, %v2077_v36  ;;  %v952_v35 = vadd.f32 %v951_v28, %v950_v19 }
 0x2d4   : > { %700 = vadd.xlane.f32.xlu0 %v699_v31  ;;  %v922_v37 = vmul.f32 %v920_v30, %v2081_v41  ;;  %v856_v38 = vmul.f32 %v854_v29, %v2081_v41 }
 0x2d5   : > { %v1003_v39 = vpop.f32.mrb[16].mxu1  ;;  %v923_v42 = vmul.f32 %v921_v63, %v921_v63  ;;  %v857_v43 = vmul.f32 %v855_v34, %v855_v34 }
 0x2d6   : > { %v1013_v44 = vsub.f32 %v1003_v39, %v1375_v33  ;;  %v1076_v45 = vsub.f32 %v2122_v60, %v1003_v39  ;;  %v1464_v46 = vpop.f32.mrb[17].mxu1  ;;  %v924_v47 = vmul.f32 %v922_v37, %v922_v37  ;;  %v858_v48 = vmul.f32 %v856_v38, %v856_v38 }
 0x2d7   : > { %v1006_v5 = vpop.f32.mrb[18].mxu1  ;;  %v925_v55 = vsel %vm410_vm1, %v923_v42, 0.0  ;;  %v859_v57 = vsel %vm410_vm1, %v857_v43, 0.0 }
 0x2d8   : > { %v1015_v50 = vmul.f32 %v1013_v44, %v2077_v36  ;;  %v1081_v51 = vsub.f32 %v1076_v45, %v1378_v2  ;;  %v1014_v53 = vsub.f32 %v1006_v5, %v1376_v40  ;;  %v1077_v54 = vsub.f32 %v2129_v16, %v1006_v5  ;;  %725 = vadd.xlane.f32.xlu0 %v724_v32  ;;  %v1465_v3 = vpop.f32.mrb[19].mxu1 }
 0x2d9   : > { %v926_v56 = vsel %vm410_vm1, %v924_v47, 0.0  ;;  %v860_v6 = vsel %vm410_vm1, %v858_v48, 0.0 }
 0x2da   : > { %v1017_v58 = vmul.f32 %v1015_v50, %v1015_v50  ;;  %v1016_v59 = vmul.f32 %v1014_v53, %v2081_v41  ;;  %v1082_v61 = vsub.f32 %v1077_v54, %v1379_v49  ;;  %v927_v62 = vadd.f32 %v926_v56, %v925_v55 }
 0x2db   : > { %v861_v0 = vadd.f32 %v860_v6, %v859_v57  ;;  %v1083_v1 = vmul.f32 %v1081_v51, %v2077_v36 }
 0x2dc   : > { %v1018_v4 = vmul.f32 %v1016_v59, %v1016_v59  ;;  %928 = vadd.xlane.f32.xlu1 %v927_v62  ;;  %v1084_v7 = vmul.f32 %v1082_v61, %v2081_v41  ;;  %v1019_v13 = vsel %vm410_vm1, %v1017_v58, 0.0 }
 0x2dd   : > { %862 = vadd.xlane.f32.xlu0 %v861_v0  ;;  %v1135_v10 = vpop.f32.mrb[20].mxu1  ;;  %v1085_v14 = vmul.f32 %v1083_v1, %v1083_v1 }
 0x2de   : > { %v1142_v15 = vsub.f32 %v1135_v10, %v2122_v60  ;;  %v1167_v17 = vsub.f32 %v2035_v8, %v1135_v10  ;;  %v1476_v18 = vpop.f32.mrb[21].mxu1  ;;  %v1020_v19 = vsel %vm410_vm1, %v1018_v4, 0.0  ;;  %v1086_v20 = vmul.f32 %v1084_v7, %v1084_v7 }
 0x2df   : > { %v1138_v21 = vpop.f32.mrb[22].mxu1  ;;  %v1021_v23 = vadd.f32 %v1020_v19, %v1019_v13  ;;  %v1087_v60 = vsel %vm410_vm1, %v1085_v14, 0.0 }
 0x2e0   : > { %v1147_v24 = vsub.f32 %v1142_v15, %v1381_v11  ;;  %v1172_v25 = vsub.f32 %v1167_v17, %v1383_v12  ;;  %v1143_v26 = vsub.f32 %v1138_v21, %v2129_v16  ;;  %v1168_v27 = vsub.f32 %v2038_v9, %v1138_v21  ;;  %v1477_v28 = vpop.f32.mrb[23].mxu1 }
 0x2e1   : > { %953 = vadd.xlane.f32.xlu0 %v952_v35  ;;  %1022 = vadd.xlane.f32.xlu1 %v1021_v23  ;;  %v1088_v8 = vsel %vm410_vm1, %v1086_v20, 0.0 }
 0x2e2   : > { %v1148_v29 = vsub.f32 %v1143_v26, %v1382_v52  ;;  %v1173_v30 = vsub.f32 %v1168_v27, %v1384_v22  ;;  %v1089_v31 = vadd.f32 %v1088_v8, %v1087_v60  ;;  %v1149_v32 = vmul.f32 %v1147_v24, %v2077_v36 }
 0x2e3   : > { %v1174_v33 = vmul.f32 %v1172_v25, %v2077_v36 }
 0x2e4   : > { %v1150_v63 = vmul.f32 %v1148_v29, %v2081_v41  ;;  %v1151_v34 = vmul.f32 %v1149_v32, %v1149_v32  ;;  %v1175_v16 = vmul.f32 %v1173_v30, %v2081_v41 }
 0x2e5   : > { %1090 = vadd.xlane.f32.xlu0 %v1089_v31  ;;  %v1176_v9 = vmul.f32 %v1174_v33, %v1174_v33 }
 0x2e6   : > { %v1152_v35 = vmul.f32 %v1150_v63, %v1150_v63  ;;  %v1177_v37 = vmul.f32 %v1175_v16, %v1175_v16  ;;  %v1153_v38 = vsel %vm410_vm1, %v1151_v34, 0.0 }
 0x2e7   : > { %v1178_v2 = vsel %vm410_vm1, %v1176_v9, 0.0 }
 0x2e8   : > { %v1154_v39 = vsel %vm410_vm1, %v1152_v35, 0.0  ;;  %v1179_v40 = vsel %vm410_vm1, %v1177_v37, 0.0 }
 0x2e9   : > { %v1155_v42 = vadd.f32 %v1154_v39, %v1153_v38  ;;  %v1180_v43 = vadd.f32 %v1179_v40, %v1178_v2 }
 0x2eb   : > { %1156 = vadd.xlane.f32.xlu1 %v1155_v42  ;;  %1181 = vadd.xlane.f32.xlu0 %v1180_v43 }
 0x34e   : > { %v546_v36 = vpop.xlane.xlu0 %545 }
 0x34f   : > { %v547_v44 = vrot.slane %v546_v36, 4 }
 0x351   : > { %v548_v45 = vadd.f32 %v547_v44, %v546_v36 }
 0x353   : > { %v549_v41 = vrot.slane %v548_v45, 2 }
 0x355   : > { %v550_v46 = vadd.f32 %v549_v41, %v548_v45 }
 0x357   : > { %v551_v47 = vrot.slane %v550_v46, 1 }
 0x359   : > { %v625_v48 = vpop.xlane.xlu1 %624  ;;  %v552_v5 = vadd.f32 %v551_v47, %v550_v46 }
 0x35a   : > { %v626_v49 = vrot.slane %v625_v48, 4 }
 0x35b   : > { %1484 = vpush %v552_v5 }
 0x35c   : > { %v627_v50 = vadd.f32 %v626_v49, %v625_v48 }
 0x35d   : > { %v795_v51 = vpop.xlane.xlu1 %794 }
 0x35e   : > { %v628_v53 = vrot.slane %v627_v50, 2  ;;  %v796_v54 = vrot.slane %v795_v51, 4 }
 0x360   : > { %v629_v3 = vadd.f32 %v628_v53, %v627_v50  ;;  %v797_v56 = vadd.f32 %v796_v54, %v795_v51 }
 0x361   : > { %v701_v55 = vpop.xlane.xlu0 %700 }
 0x362   : > { %v702_v57 = vrot.slane %v701_v55, 4  ;;  %v630_v6 = vrot.slane %v629_v3, 1  ;;  %v798_v61 = vrot.slane %v797_v56, 2 }
 0x364   : > { %v703_v58 = vadd.f32 %v702_v57, %v701_v55  ;;  %v631_v59 = vadd.f32 %v630_v6, %v629_v3  ;;  %v799_v11 = vadd.f32 %v798_v61, %v797_v56 }
 0x365   : > { %v726_v62 = vpop.xlane.xlu0 %725 }
 0x366   : > { %v704_v0 = vrot.slane %v703_v58, 2  ;;  %v727_v1 = vrot.slane %v726_v62, 4  ;;  %1486 = vpush %v631_v59  ;;  %v800_v52 = vrot.slane %v799_v11, 1 }
 0x368   : > { %v728_v4 = vadd.f32 %v727_v1, %v726_v62  ;;  %v705_v7 = vadd.f32 %v704_v0, %v703_v58  ;;  %v801_v31 = vadd.f32 %v800_v52, %v799_v11 }
 0x369   : > { %v929_v10 = vpop.xlane.xlu1 %928 }
 0x36a   : > { %v729_v12 = vrot.slane %v728_v4, 2  ;;  %v930_v13 = vrot.slane %v929_v10, 4  ;;  %v863_v14 = vpop.xlane.xlu0 %862  ;;  %v706_v15 = vrot.slane %v705_v7, 1 }
 0x36b   : > { %v864_v17 = vrot.slane %v863_v14, 4 }
 0x36c   : > { %v931_v18 = vadd.f32 %v930_v13, %v929_v10  ;;  %v707_v19 = vadd.f32 %v706_v15, %v705_v7  ;;  %v730_v20 = vadd.f32 %v729_v12, %v728_v4 }
 0x36d   : > { %v865_v21 = vadd.f32 %v864_v17, %v863_v14 }
 0x36e   : > { %v932_v22 = vrot.slane %v931_v18, 2  ;;  %v954_v23 = vpop.xlane.xlu0 %953  ;;  %1488 = vpush %v707_v19  ;;  %v1023_v24 = vpop.xlane.xlu1 %1022  ;;  %v731_v25 = vrot.slane %v730_v20, 1 }
 0x36f   : > { %v866_v26 = vrot.slane %v865_v21, 2  ;;  %v955_v27 = vrot.slane %v954_v23, 4  ;;  %v1024_v28 = vrot.slane %v1023_v24, 4 }
 0x370   : > { %v732_v60 = vadd.f32 %v731_v25, %v730_v20  ;;  %v933_v8 = vadd.f32 %v932_v22, %v931_v18 }
 0x371   : > { %v956_v29 = vadd.f32 %v955_v27, %v954_v23  ;;  %v1025_v30 = vadd.f32 %v1024_v28, %v1023_v24  ;;  %v867_v32 = vadd.f32 %v866_v26, %v865_v21 }
 0x372   : > { %v1091_v33 = vpop.xlane.xlu0 %1090  ;;  %1490 = vpush %v732_v60  ;;  %v934_v63 = vrot.slane %v933_v8, 1 }
 0x373   : > { %v957_v34 = vrot.slane %v956_v29, 2  ;;  %v1026_v16 = vrot.slane %v1025_v30, 2  ;;  %v1092_v9 = vrot.slane %v1091_v33, 4  ;;  %1492 = vpush %v801_v31  ;;  %v868_v35 = vrot.slane %v867_v32, 1 }
 0x374   : > { %v935_v37 = vadd.f32 %v934_v63, %v933_v8 }
 0x375   : > { %v1093_v38 = vadd.f32 %v1092_v9, %v1091_v33  ;;  %v869_v39 = vadd.f32 %v868_v35, %v867_v32  ;;  %v958_v2 = vadd.f32 %v957_v34, %v956_v29  ;;  %v1027_v40 = vadd.f32 %v1026_v16, %v1025_v30 }
 0x377   : > { %v1094_v42 = vrot.slane %v1093_v38, 2  ;;  %1494 = vpush %v869_v39  ;;  %v959_v43 = vrot.slane %v958_v2, 1  ;;  %v1028_v36 = vrot.slane %v1027_v40, 1 }
 0x378   : > { %1496 = vpush %v935_v37  ;;  %v1157_v44 = vpop.xlane.xlu1 %1156  ;;  %v1182_v45 = vpop.xlane.xlu0 %1181 }
 0x379   : > { %v1158_v41 = vrot.slane %v1157_v44, 4  ;;  %v1183_v46 = vrot.slane %v1182_v45, 4  ;;  %v960_v47 = vadd.f32 %v959_v43, %v958_v2  ;;  %v1029_v48 = vadd.f32 %v1028_v36, %v1027_v40 }
 0x37a   : > { %v1095_v5 = vadd.f32 %v1094_v42, %v1093_v38 }
 0x37b   : > { %v1159_v49 = vadd.f32 %v1158_v41, %v1157_v44  ;;  %v1184_v50 = vadd.f32 %v1183_v46, %v1182_v45  ;;  %1498 = vpush %v960_v47 }
 0x37c   : > { %1500 = vpush %v1029_v48  ;;  %v1096_v51 = vrot.slane %v1095_v5, 1 }
 0x37d   : > { %v1160_v53 = vrot.slane %v1159_v49, 2  ;;  %v1185_v54 = vrot.slane %v1184_v50, 2 }
 0x37e   : > { %v1097_v3 = vadd.f32 %v1096_v51, %v1095_v5 }
 0x37f   : > { %v1161_v55 = vadd.f32 %v1160_v53, %v1159_v49  ;;  %v1186_v56 = vadd.f32 %v1185_v54, %v1184_v50 }
 0x380   : > { %1502 = vpush %v1097_v3 }
 0x381   : > { %v1162_v57 = vrot.slane %v1161_v55, 1  ;;  %v1187_v6 = vrot.slane %v1186_v56, 1 }
 0x383   : > { %v1163_v58 = vadd.f32 %v1162_v57, %v1161_v55  ;;  %v1188_v59 = vadd.f32 %v1187_v6, %v1186_v56 }
 0x385   : > { %1504 = vpush %v1163_v58 }
 0x386   : > { %1506 = vpush %v1188_v59 }
 0x38c   : > { %s1485_s11 = spop %1484 }
 0x397   : > { %s1487_s16 = spop %1486 }
 0x398   : > { %s633_s18 = smul.f32 5.0, %s1487_s16 }
 0x39a   : > { %s634_s24 = sadd.f32 %s1485_s11, %s633_s18 }
 0x39f   : > { %s1489_s15 = spop %1488 }
 0x3a0   : > { %s709_s13 = smul.f32 10.0, %s1489_s15 }
 0x3a2   : > { %s710_s8 = sadd.f32 %s709_s13, %s634_s24 }
 0x3a3   : > { %s1491_s12 = spop %1490 }
 0x3a4   : > { %s734_s27 = smul.f32 20.0, %s1491_s12  ;;  %s1493_s0 = spop %1492 }
 0x3a6   : > { %s735_s10 = sadd.f32 %s734_s27, %s710_s8 }
 0x3a8   : > { %s803_s17 = sadd.f32 %s1493_s0, %s735_s10  ;;  %s1495_s7 = spop %1494 }
 0x3a9   : > { %s871_s9 = smul.f32 5.0, %s1495_s7  ;;  %s1497_s14 = spop %1496 }
 0x3aa   : > { %s937_s29 = smul.f32 10.0, %s1497_s14 }
 0x3ab   : > { %s872_s30 = sadd.f32 %s871_s9, %s803_s17  ;;  %s389_s17 = scalar_lea.vmem %s2203_s5, %s2238_s21 }
 0x3ac   : > { %s1499_s28 = spop %1498 }
 0x3ad   : > { %s938_s26 = sadd.f32 %s937_s29, %s872_s30  ;;  %s962_s1 = smul.f32 20.0, %s1499_s28 }
 0x3ae   : > { %s1501_s2 = spop %1500 }
 0x3af   : > { %s963_s16 = sadd.f32 %s962_s1, %s938_s26 }
 0x3b1   : > { %s1503_s15 = spop %1502  ;;  %s1031_s11 = sadd.f32 %s1501_s2, %s963_s16 }
 0x3b2   : > { %s1099_s18 = smul.f32 5.0, %s1503_s15 }
 0x3b4   : > { %s1100_s13 = sadd.f32 %s1099_s18, %s1031_s11 }
 0x3b6   : > { %s1505_s24 = spop %1504 }
 0x3b7   : > { %s1165_s12 = smul.f32 10.0, %s1505_s24  ;;  %s1507_s8 = spop %1506 }
 0x3b8   : > { %s1190_s10 = smul.f32 20.0, %s1507_s8 }
 0x3b9   : > { %s1166_s27 = sadd.f32 %s1165_s12, %s1100_s13 }
 0x3bb   : > { %s1191_s9 = sadd.f32 %s1190_s10, %s1166_s27 }
 0x3bd   : > { %v1192_v61 = vstv %s1191_s9 }
 0x3be   : > { %1195 = vst.msk [vmem:[%s389_s17] sm:$0x1] %vm1194_vm2, %v1192_v61 }
 0x3bf PF: > { %s22_s23 = sadd.s32 1, %s1740_s23   ;;  %s2230_s18 = smov %s1724_s19 }
 0x3c0   : > { %p19_p7 = scmp.ge.s32.totalorder %s22_s23, 4   ;;  %s2231_s19 = smov %s1728_s20 }
 0x3c1   : > { %s2232_s20 = smov %s1847_s6  ;;  %s2233_s21 = smov %s1736_s22 }
 0x3c2   : > { %s2234_s22 = smov %s2236_s25  ;;  %21 = sbr.rel (!%p19_p7) target bundleno = 11 (0xb), region = 126 }
 0x3c9   :  { %1219 = vsyncpa [#allocation3], 1 }
 0x3ca   :  { %1221 = vsyncpa [#allocation3 + $0x1], 1 }
 0x3cb   :  { %1222 = vsyncpa [#allocation5], 1 }
 0x3cc   :  { %1224 = vsyncpa [#allocation5 + $0x1], 1 }
 0x3cd   :  { %1225 = vsyncpa [#allocation8], 1 }

</bundles_post_ra>
